<compile_context>
chip_gen: v6e
topology: v6e:2x2x1
jax: 0.10.0
libtpu: 0.0.40
codegen_flags: <defaults>
</compile_context>

<pallas_src>
import jax
import jax.numpy as jnp
from jax.experimental import pallas as pl
from jax.experimental.pallas import tpu as pltpu

# ---------------- configuration (small synthetic SAM2) ----------------
IMAGE_SIZE = 32                                   # self.image_size (square resize target)
ORIG_H = ORIG_W = 48                              # original frame size before preprocess
C_IN = 3
PATCH = 4                                         # patch_embed kernel == stride -> 8x8 tokens
D_MODEL = 32                                      # FPN / decoder width (SAM2 uses 256)
STAGE_DIMS = [(16, 16), (16, 32), (32, 32), (32, 64)]  # (d_in, d_out) per trunk stage
STAGE_POOL = [True, False, True, False]           # 2x2 avg pool after recording stage output
PIXEL_MEAN = jnp.array([123.675, 116.28, 103.53], jnp.float32)
PIXEL_STD = jnp.array([58.395, 57.12, 57.375], jnp.float32)

LANE = 128                                        # TPU lane width; channel dims padded to it
GRID = IMAGE_SIZE // PATCH                        # 8  -> 8x8 patch tokens
N_TOK0 = GRID * GRID                              # 64 tokens at level-0 resolution
N_TOK1 = N_TOK0 // 4                              # 16 tokens at level-1/2 resolution
VMEM_LIMIT = 32 * 1024 * 1024                     # explicit VMEM budget (fits v7x's 64 MiB)


# ---------------- small helpers ----------------
def _rup(n, m):
    return ((n + m - 1) // m) * m


def _pad_axis(a, axis, size):
    if a.shape[axis] >= size:
        return a
    widths = [(0, 0)] * a.ndim
    widths[axis] = (0, size - a.shape[axis])
    return jnp.pad(a, widths)


def _prep_w(w):
    """Zero-pad both dims of a weight matrix to 128 multiples, cast bf16 for the MXU."""
    w = _pad_axis(w, 0, _rup(w.shape[0], LANE))
    w = _pad_axis(w, 1, _rup(w.shape[1], LANE))
    return w.astype(jnp.bfloat16)


def _prep_b(b):
    b = _pad_axis(b.reshape(1, -1), 1, _rup(b.shape[-1], LANE))
    return b.astype(jnp.float32)


def _pool_matrix(h, w):
    """(h/2*w/2, h*w) matrix performing 2x2 average pooling over a row-major token grid."""
    ho, wo = h // 2, w // 2
    out_idx = jnp.arange(ho * wo)
    yo, xo = out_idx // wo, out_idx % wo
    in_idx = jnp.arange(h * w)
    yi, xi = in_idx // w, in_idx % w
    sel = (yi[None, :] // 2 == yo[:, None]) & (xi[None, :] // 2 == xo[:, None])
    return sel.astype(jnp.float32) * 0.25


# ---------------- kernel 1: fused patch-embed + trunk + neck (per-frame grid) ----------------
def _trunk_neck_kernel(xp_ref, pos_ref, pw_ref, pb_ref,
                       sw1_ref, sb1_ref, sw2_ref, sb2_ref,
                       nw_ref, nb_ref, pool0_ref,
                       fpn0_ref, fpn1_ref, fpn2_ref):
    f32, bf16 = jnp.float32, jnp.bfloat16

    def mlp(t, i):
        # TODO(synk): PyTorch nn.GELU defaults to exact erf; tanh approximation used here.
        h = jnp.dot(t.astype(bf16), sw1_ref[i], preferred_element_type=f32) + sb1_ref[i]
        h = jax.nn.gelu(h, approximate=True)
        return jnp.dot(h.astype(bf16), sw2_ref[i], preferred_element_type=f32) + sb2_ref[i]

    def neck(v, i):
        return jnp.dot(v.astype(bf16), nw_ref[i], preferred_element_type=f32) + nb_ref[i]

    # patch embed (mean/std fold is in pw/pb) + pos-embed add, f32 accumulation
    tok = (jnp.dot(xp_ref[0], pw_ref[...], preferred_element_type=f32)
           + pb_ref[...] + pos_ref[0])

    vis0 = mlp(tok, 0)                                           # (64, 128)  @ 8x8
    # fused 2x2 average pool (tiny MXU matmul; no HBM round-trip / XLA reshape-mean)
    tok = jnp.dot(pool0_ref[...], vis0.astype(bf16), preferred_element_type=f32)  # (16, 128)
    vis1 = mlp(tok, 1)                                           # (16, 128)  @ 4x4
    vis2 = mlp(vis1, 2)                                          # (16, 128)  @ 4x4
    # stage 3 + its pool are dead code: the deepest neck level is dropped before use.

    fpn0_ref[0] = neck(vis0, 0).astype(fpn0_ref.dtype)           # neck0 ∘ conv_s0 (folded)
    fpn1_ref[0] = neck(vis1, 1).astype(fpn1_ref.dtype)           # neck1 ∘ conv_s1 (folded)
    fpn2_ref[0] = neck(vis2, 2).astype(fpn2_ref.dtype)           # neck2 (+ no_mem_embed folded)


def trunk_neck_forward(pp, x):
    """Resized NHWC frames -> bf16 FPN features for levels 0/1/2, one pallas_call."""
    BT = x.shape[0]
    # TODO(synk): at real SAM2 sizes express patch extraction via a BlockSpec index_map so
    # the gather happens in the DMA instead of an XLA transpose; negligible at this scale.
    xp = x.reshape(BT, GRID, PATCH, GRID, PATCH, C_IN).transpose(0, 1, 3, 2, 4, 5)
    xp = xp.reshape(BT, N_TOK0, PATCH * PATCH * C_IN)
    xp = _pad_axis(xp, 2, LANE).astype(jnp.bfloat16)             # bf16 input stream

    args = [xp, pp["pos_embed"], pp["patch_w"], pp["patch_b"],
            pp["stage_w1"], pp["stage_b1"], pp["stage_w2"], pp["stage_b2"],
            pp["neck_w"], pp["neck_b"], pp["pool0"]]
    in_specs = [
        pl.BlockSpec((1, N_TOK0, LANE), lambda i: (i, 0, 0)),            # per-frame tokens
        pl.BlockSpec((1, N_TOK0, LANE), lambda i: (0, 0, 0)),            # shared pos-embed
        pl.BlockSpec(pp["patch_w"].shape, lambda i: (0, 0)),
        pl.BlockSpec(pp["patch_b"].shape, lambda i: (0, 0)),
        pl.BlockSpec(pp["stage_w1"].shape, lambda i: (0, 0, 0)),
        pl.BlockSpec(pp["stage_b1"].shape, lambda i: (0, 0, 0)),
        pl.BlockSpec(pp["stage_w2"].shape, lambda i: (0, 0, 0)),
        pl.BlockSpec(pp["stage_b2"].shape, lambda i: (0, 0, 0)),
        pl.BlockSpec(pp["neck_w"].shape, lambda i: (0, 0, 0)),
        pl.BlockSpec(pp["neck_b"].shape, lambda i: (0, 0, 0)),
        pl.BlockSpec(pp["pool0"].shape, lambda i: (0, 0)),
    ]
    out_shape = (
        jax.ShapeDtypeStruct((BT, N_TOK0, LANE), jnp.bfloat16),
        jax.ShapeDtypeStruct((BT, N_TOK1, LANE), jnp.bfloat16),
        jax.ShapeDtypeStruct((BT, N_TOK1, LANE), jnp.bfloat16),
    )
    out_specs = (
        pl.BlockSpec((1, N_TOK0, LANE), lambda i: (i, 0, 0)),
        pl.BlockSpec((1, N_TOK1, LANE), lambda i: (i, 0, 0)),
        pl.BlockSpec((1, N_TOK1, LANE), lambda i: (i, 0, 0)),
    )
    return pl.pallas_call(
        _trunk_neck_kernel,
        out_shape=out_shape,
        grid=(BT,),
        in_specs=in_specs,
        out_specs=out_specs,
        compiler_params=pltpu.CompilerParams(
            dimension_semantics=("parallel",),
            vmem_limit_bytes=VMEM_LIMIT),
    )(*args)


# ---------------- kernel 2: fused SAM mask-decoder head (per-frame grid) ----------------
def _decoder_kernel(q_ref, pix_ref, s1_ref, s0_ref, wup_ref,
                    hw1_ref, hb1_ref, hw2_ref, hb2_ref,
                    u1w_ref, u1b_ref, u2w_ref, u2b_ref, o_ref):
    f32, bf16 = jnp.float32, jnp.bfloat16
    # hypernetwork MLP on this frame's prompt query
    h = jnp.dot(q_ref[0].astype(bf16), hw1_ref[...], preferred_element_type=f32) + hb1_ref[...]
    h = jax.nn.gelu(h, approximate=True)
    hyper = jnp.dot(h.astype(bf16), hw2_ref[...], preferred_element_type=f32) + hb2_ref[...]

    # upscale path: pix (level-2) -> +s1 (level-1) -> 2x bilinear up -> +s0 (level-0)
    u1 = jnp.dot(pix_ref[0], u1w_ref[...], preferred_element_type=f32) + u1b_ref[...]
    u1 = jax.nn.gelu(u1 + s1_ref[0].astype(f32), approximate=True)            # (16, 128)
    u1_up = jnp.dot(wup_ref[...], u1.astype(bf16), preferred_element_type=f32)  # (64, 128)
    u2 = jnp.dot(u1_up.astype(bf16), u2w_ref[...], preferred_element_type=f32) + u2b_ref[...]
    u2 = jax.nn.gelu(u2 + s0_ref[0].astype(f32), approximate=True)            # (64, 128)

    # per-pixel mask logits = <upscaled embedding, hyper(query)>: VPU mul + lane reduce,
    # stored as one lane-contiguous 64-wide row (padded lanes are exactly zero).
    o_ref[0, 0, :] = jnp.sum(u2 * hyper, axis=-1)


def decode_masks(pp, q, pix, s1, s0):
    B = q.shape[0]
    args = [q, pix, s1, s0, pp["w_up"],
            pp["hyper_w1"], pp["hyper_b1"], pp["hyper_w2"], pp["hyper_b2"],
            pp["up1_w"], pp["up1_b"], pp["up2_w"], pp["up2_b"]]
    in_specs = [
        pl.BlockSpec((1, 1, LANE), lambda i: (i, 0, 0)),                  # query
        pl.BlockSpec((1, N_TOK1, LANE), lambda i: (i, 0, 0)),             # pix feat (level 2)
        pl.BlockSpec((1, N_TOK1, LANE), lambda i: (i, 0, 0)),             # s1 (level 1)
        pl.BlockSpec((1, N_TOK0, LANE), lambda i: (i, 0, 0)),             # s0 (level 0)
        pl.BlockSpec(pp["w_up"].shape, lambda i: (0, 0)),
        pl.BlockSpec(pp["hyper_w1"].shape, lambda i: (0, 0)),
        pl.BlockSpec(pp["hyper_b1"].shape, lambda i: (0, 0)),
        pl.BlockSpec(pp["hyper_w2"].shape, lambda i: (0, 0)),
        pl.BlockSpec(pp["hyper_b2"].shape, lambda i: (0, 0)),
        pl.BlockSpec(pp["up1_w"].shape, lambda i: (0, 0)),
        pl.BlockSpec(pp["up1_b"].shape, lambda i: (0, 0)),
        pl.BlockSpec(pp["up2_w"].shape, lambda i: (0, 0)),
        pl.BlockSpec(pp["up2_b"].shape, lambda i: (0, 0)),
    ]
    return pl.pallas_call(
        _decoder_kernel,
        out_shape=jax.ShapeDtypeStruct((B, 1, N_TOK0), jnp.float32),
        grid=(B,),
        in_specs=in_specs,
        out_specs=pl.BlockSpec((1, 1, N_TOK0), lambda i: (i, 0, 0)),
        compiler_params=pltpu.CompilerParams(
            dimension_semantics=("parallel",),
            vmem_limit_bytes=VMEM_LIMIT),
    )(*args)


# ---------------- deterministic parameter init ----------------
def _init(key, idx, shape, scale=0.02):
    return scale * jax.random.normal(jax.random.fold_in(key, idx), shape, jnp.float32)


def make_params(seed=42):
    """Raw, torch-layout parameters (true channel widths, f32)."""
    key = jax.random.PRNGKey(seed)
    counter = iter(range(10_000))
    p = {}

    def nxt(shape, scale=0.02):
        return _init(key, next(counter), shape, scale)

    p["patch_w"] = nxt((C_IN * PATCH * PATCH, STAGE_DIMS[0][0]))
    p["patch_b"] = jnp.zeros((STAGE_DIMS[0][0],), jnp.float32)
    p["pos_embed"] = nxt((1, GRID, GRID, STAGE_DIMS[0][0]))
    for i, (din, dout) in enumerate(STAGE_DIMS):
        p[f"stage{i}_w1"] = nxt((din, 2 * din))
        p[f"stage{i}_b1"] = jnp.zeros((2 * din,), jnp.float32)
        p[f"stage{i}_w2"] = nxt((2 * din, dout))
        p[f"stage{i}_b2"] = jnp.zeros((dout,), jnp.float32)
    for i, (_, dout) in enumerate(STAGE_DIMS):
        p[f"neck{i}_w"] = nxt((dout, D_MODEL))
        p[f"neck{i}_b"] = jnp.zeros((D_MODEL,), jnp.float32)
    p["conv_s0_w"] = nxt((D_MODEL, D_MODEL // 8))
    p["conv_s0_b"] = jnp.zeros((D_MODEL // 8,), jnp.float32)
    p["conv_s1_w"] = nxt((D_MODEL, D_MODEL // 4))
    p["conv_s1_b"] = jnp.zeros((D_MODEL // 4,), jnp.float32)
    p["no_mem_embed"] = nxt((1, D_MODEL))
    p["point_fourier"] = nxt((2, D_MODEL // 2), 1.0)
    p["label_embed"] = nxt((2, D_MODEL))
    p["mask_token"] = nxt((D_MODEL,))
    p["hyper_w1"] = nxt((D_MODEL, D_MODEL))
    p["hyper_b1"] = jnp.zeros((D_MODEL,), jnp.float32)
    p["hyper_w2"] = nxt((D_MODEL, D_MODEL // 8))
    p["hyper_b2"] = jnp.zeros((D_MODEL // 8,), jnp.float32)
    p["up1_w"] = nxt((D_MODEL, D_MODEL // 4))
    p["up1_b"] = jnp.zeros((D_MODEL // 4,), jnp.float32)
    p["up2_w"] = nxt((D_MODEL // 4, D_MODEL // 8))
    p["up2_b"] = jnp.zeros((D_MODEL // 8,), jnp.float32)
    return p


def prepare_params(raw):
    """Fold pixel norm / conv_s* / no_mem_embed, pad channels to 128 lanes, stack per-stage."""
    pp = {}
    # (1) fold (x - mean)/std into the patch-embed weights: im2col K order is (py, px, c);
    #     valid because the bilinear resize weights sum to 1, so normalize commutes with it.
    inv_std = jnp.tile(1.0 / PIXEL_STD, PATCH * PATCH)
    mean = jnp.tile(PIXEL_MEAN, PATCH * PATCH)
    patch_w = raw["patch_w"] * inv_std[:, None]
    patch_b = raw["patch_b"] - (mean * inv_std) @ raw["patch_w"]
    pp["patch_w"] = _prep_w(patch_w)                     # K 48->128, N 16->128
    pp["patch_b"] = _prep_b(patch_b)
    pp["pos_embed"] = _pad_axis(raw["pos_embed"].reshape(1, N_TOK0, -1), 2, LANE)  # (1,64,128)

    # (2) only the 3 trunk stages whose outputs are consumed (stage 3 is dead code)
    pp["stage_w1"] = jnp.stack([_prep_w(raw[f"stage{i}_w1"]) for i in range(3)])
    pp["stage_b1"] = jnp.stack([_prep_b(raw[f"stage{i}_b1"]) for i in range(3)])
    pp["stage_w2"] = jnp.stack([_prep_w(raw[f"stage{i}_w2"]) for i in range(3)])
    pp["stage_b2"] = jnp.stack([_prep_b(raw[f"stage{i}_b2"]) for i in range(3)])

    # (3) compose conv_s0/conv_s1 into neck0/neck1 (back-to-back linear maps), fold
    #     no_mem_embed into the level-2 neck bias (nothing else consumes those features).
    nw, nb = [], []
    w0 = raw["neck0_w"] @ raw["conv_s0_w"]
    b0 = raw["neck0_b"] @ raw["conv_s0_w"] + raw["conv_s0_b"]
    nw.append(_prep_w(w0)); nb.append(_prep_b(b0))
    w1 = raw["neck1_w"] @ raw["conv_s1_w"]
    b1 = raw["neck1_b"] @ raw["conv_s1_w"] + raw["conv_s1_b"]
    nw.append(_prep_w(w1)); nb.append(_prep_b(b1))
    nw.append(_prep_w(raw["neck2_w"]))
    nb.append(_prep_b(raw["neck2_b"] + raw["no_mem_embed"][0]))
    pp["neck_w"] = jnp.stack(nw)
    pp["neck_b"] = jnp.stack(nb)

    # (4) fused 2x2 average-pool matrix (8x8 tokens -> 4x4 tokens), bf16 for the MXU.
    pp["pool0"] = _pool_matrix(GRID, GRID).astype(jnp.bfloat16)

    # decoder-head weights
    pp["hyper_w1"] = _prep_w(raw["hyper_w1"]); pp["hyper_b1"] = _prep_b(raw["hyper_b1"])
    pp["hyper_w2"] = _prep_w(raw["hyper_w2"]); pp["hyper_b2"] = _prep_b(raw["hyper_b2"])
    pp["up1_w"] = _prep_w(raw["up1_w"]); pp["up1_b"] = _prep_b(raw["up1_b"])
    pp["up2_w"] = _prep_w(raw["up2_w"]); pp["up2_b"] = _prep_b(raw["up2_b"])

    # prompt-encoder params (tiny JAX glue; kept at true width)
    pp["point_fourier"] = raw["point_fourier"]
    pp["label_embed"] = raw["label_embed"]
    pp["mask_token"] = raw["mask_token"]

    # (5) 2x bilinear upsample of the pix-feat grid as a constant (S_out, S_in) matrix,
    #     fused into the decoder-head kernel; bf16 so every MXU operand is bf16.
    hp = GRID // 2                                        # pix-feat spatial size (4)
    eye = jnp.eye(hp * hp, dtype=jnp.float32).reshape(hp * hp, hp, hp)
    up = jax.image.resize(eye, (hp * hp, 2 * hp, 2 * hp), method="linear")
    pp["w_up"] = up.reshape(hp * hp, 4 * hp * hp).T.astype(jnp.bfloat16)   # (64, 16)
    return pp


# ---------------- forward-pass pieces ----------------
def preprocess_visual_features(samples, image_size):
    """(B, T, C, H, W) -> resized (B*T, S, S, C) NHWC. mean/std normalization is folded
    into the patch-embed weights (bilinear resize weights sum to 1, so it commutes)."""
    B, T, C, H, W = samples.shape
    x = samples.reshape(B * T, C, H, W)
    orig_size = [(H, W)] * (B * T)
    x_nhwc = jnp.transpose(x, (0, 2, 3, 1))
    # TODO(synk): torch F.interpolate(antialias=True) uses a slightly different antialias
    # filter than jax.image.resize; no clean Pallas equivalent for the resampling itself.
    x_rs = jax.image.resize(
        x_nhwc, (B * T, image_size, image_size, C), method="linear", antialias=True
    )
    return x_rs, (B, T), orig_size


def encode_prompts(pp, point_coords, point_labels):
    """Batched point-prompt encoding (tiny JAX glue) -> lane-padded queries (B, 1, 128)."""
    coords = point_coords.astype(jnp.float32)                       # (B, P, 2)
    c = 2.0 * (coords / IMAGE_SIZE) - 1.0
    proj = jnp.einsum("bpk,kd->bpd", c, pp["point_fourier"]) * (2.0 * jnp.pi)
    pe = jnp.concatenate([jnp.sin(proj), jnp.cos(proj)], axis=-1)   # (B, P, D_MODEL)
    pe = pe + jnp.take(pp["label_embed"], point_labels, axis=0)
    q = pp["mask_token"][None, :] + jnp.mean(pe, axis=1)            # (B, D_MODEL)
    return _pad_axis(q, 1, LANE)[:, None, :]                        # (B, 1, 128)


def compute_mask(low_res_mask, image_size, orig_size):
    # TODO(synk): DecoderOutput.compute_mask internals unknown; bilinear resize to
    # image_size then to orig_size (align_corners=False semantics).
    m = jnp.transpose(low_res_mask, (0, 2, 3, 1))
    m = jax.image.resize(m, (m.shape[0], image_size, image_size, m.shape[-1]), method="linear")
    m = jax.image.resize(m, (m.shape[0], orig_size[0], orig_size[1], m.shape[-1]), method="linear")
    return jnp.transpose(m, (0, 3, 1, 2))


def promptable_sam2_forward(pp, samples, targets):
    x, (B, T), orig_size = preprocess_visual_features(samples, IMAGE_SIZE)
    # one fused pallas_call for patch-embed + trunk + neck (+conv_s0/s1 folds), per-frame grid
    fpn0, fpn1, fpn2 = trunk_neck_forward(pp, x)
    # one fused, batched pallas_call for the SAM mask-decoder head on the B prompted frames
    # (frames 0..B-1 of the B*T axis), replacing the reference per-frame Python loop.
    q = encode_prompts(pp, targets["point_coords"], targets["point_labels"])
    low_res = decode_masks(pp, q, fpn2[:B], fpn1[:B], fpn0[:B])     # (B, 1, 64)
    side = GRID                                                     # 2 * (GRID // 2) = 8
    low_res = low_res.reshape(B, 1, side, side)                     # (B, 1, 8, 8)
    masks = compute_mask(low_res, IMAGE_SIZE, orig_size[0])         # (B, 1, H, W)
    return {"pred_masks": masks[:, 0]}                              # .squeeze(1)


# ---------------- demo ----------------
if __name__ == "__main__":
    B, T = 2, 1
    key = jax.random.PRNGKey(0)
    k_img, _ = jax.random.split(key)
    samples = jax.random.uniform(
        k_img, (B, T, C_IN, ORIG_H, ORIG_W), minval=0.0, maxval=255.0, dtype=jnp.float32
    )
    point_coords = jnp.array(
        [[[8.0, 8.0], [20.0, 12.0]], [[4.0, 24.0], [16.0, 16.0]]], jnp.float32
    )  # (B, P, 2) in resized-image coordinates
    point_labels = jnp.array([[1, 0], [1, 1]], jnp.int32)  # (B, P)
    targets = {"point_coords": point_coords, "point_labels": point_labels}

    params = prepare_params(make_params(seed=42))
    forward = jax.jit(promptable_sam2_forward)
    out = forward(params, samples, targets)
    pred_masks = jax.block_until_ready(out["pred_masks"])
    assert pred_masks.shape == (B, ORIG_H, ORIG_W)
    assert pred_masks.dtype == jnp.float32
    assert bool(jnp.all(jnp.isfinite(pred_masks)))
    print("KERNEL_OK")
</pallas_src>

<mosaic_0001>
module attributes {stable_mosaic.version = 11 : i64} {
  func.func @_trunk_neck_kernel(%arg0: i32, %arg1: memref<1x64x128xbf16, #tpu.memory_space<vmem>>, %arg2: memref<1x64x128xf32, #tpu.memory_space<vmem>>, %arg3: memref<128x128xbf16, #tpu.memory_space<vmem>>, %arg4: memref<1x128xf32, #tpu.memory_space<vmem>>, %arg5: memref<3x128x128xbf16, #tpu.memory_space<vmem>>, %arg6: memref<3x1x128xf32, #tpu.memory_space<vmem>>, %arg7: memref<3x128x128xbf16, #tpu.memory_space<vmem>>, %arg8: memref<3x1x128xf32, #tpu.memory_space<vmem>>, %arg9: memref<3x128x128xbf16, #tpu.memory_space<vmem>>, %arg10: memref<3x1x128xf32, #tpu.memory_space<vmem>>, %arg11: memref<16x64xbf16, #tpu.memory_space<vmem>>, %arg12: memref<1x64x128xbf16, #tpu.memory_space<vmem>>, %arg13: memref<1x16x128xbf16, #tpu.memory_space<vmem>>, %arg14: memref<1x16x128xbf16, #tpu.memory_space<vmem>>) attributes {dimension_semantics = [#tpu.dimension_semantics<parallel>], iteration_bounds = array<i64: 2>, scalar_prefetch = 0 : i64, scratch_operands = 0 : i64, tpu.core_type = #tpu.core_type<tc>, window_params = [{transform_indices = @transform_0, window_bounds = array<i64: 1, 64, 128>}, {pipeline_mode = #tpu.pipeline_mode<synchronous>, transform_indices = @transform_1, window_bounds = array<i64: 1, 64, 128>}, {pipeline_mode = #tpu.pipeline_mode<synchronous>, transform_indices = @transform_2, window_bounds = array<i64: 128, 128>}, {pipeline_mode = #tpu.pipeline_mode<synchronous>, transform_indices = @transform_3, window_bounds = array<i64: 1, 128>}, {pipeline_mode = #tpu.pipeline_mode<synchronous>, transform_indices = @transform_4, window_bounds = array<i64: 3, 128, 128>}, {pipeline_mode = #tpu.pipeline_mode<synchronous>, transform_indices = @transform_5, window_bounds = array<i64: 3, 1, 128>}, {pipeline_mode = #tpu.pipeline_mode<synchronous>, transform_indices = @transform_6, window_bounds = array<i64: 3, 128, 128>}, {pipeline_mode = #tpu.pipeline_mode<synchronous>, transform_indices = @transform_7, window_bounds = array<i64: 3, 1, 128>}, {pipeline_mode = #tpu.pipeline_mode<synchronous>, transform_indices = @transform_8, window_bounds = array<i64: 3, 128, 128>}, {pipeline_mode = #tpu.pipeline_mode<synchronous>, transform_indices = @transform_9, window_bounds = array<i64: 3, 1, 128>}, {pipeline_mode = #tpu.pipeline_mode<synchronous>, transform_indices = @transform_10, window_bounds = array<i64: 16, 64>}, {transform_indices = @transform_11, window_bounds = array<i64: 1, 64, 128>}, {transform_indices = @transform_12, window_bounds = array<i64: 1, 16, 128>}, {transform_indices = @transform_13, window_bounds = array<i64: 1, 16, 128>}]} {
    %c0 = arith.constant 0 : index
    %c0_0 = arith.constant 0 : index
    %c0_1 = arith.constant 0 : index
    %0 = vector.load %arg1[%c0, %c0_0, %c0_1] : memref<1x64x128xbf16, #tpu.memory_space<vmem>>, vector<1x64x128xbf16>
    %1 = vector.shape_cast %0 : vector<1x64x128xbf16> to vector<64x128xbf16>
    %c0_2 = arith.constant 0 : index
    %c0_3 = arith.constant 0 : index
    %2 = vector.load %arg3[%c0_2, %c0_3] : memref<128x128xbf16, #tpu.memory_space<vmem>>, vector<128x128xbf16>
    %cst = arith.constant dense<0.000000e+00> : vector<64x128xf32>
    %3 = tpu.matmul %1, %2, %cst {dimension_numbers = #tpu.dot_dimension_numbers<[1], [0], [0], [1], [0, 0, 1, 1], [], []>} : vector<64x128xbf16>, vector<128x128xbf16>, vector<64x128xf32> -> vector<64x128xf32>
    %c0_4 = arith.constant 0 : index
    %c0_5 = arith.constant 0 : index
    %4 = vector.load %arg4[%c0_4, %c0_5] : memref<1x128xf32, #tpu.memory_space<vmem>>, vector<1x128xf32>
    %5 = vector.broadcast %4 : vector<1x128xf32> to vector<64x128xf32>
    %6 = arith.addf %3, %5 : vector<64x128xf32>
    %c0_6 = arith.constant 0 : index
    %c0_7 = arith.constant 0 : index
    %c0_8 = arith.constant 0 : index
    %7 = vector.load %arg2[%c0_6, %c0_7, %c0_8] : memref<1x64x128xf32, #tpu.memory_space<vmem>>, vector<1x64x128xf32>
    %8 = vector.shape_cast %7 : vector<1x64x128xf32> to vector<64x128xf32>
    %9 = arith.addf %6, %8 : vector<64x128xf32>
    %10 = arith.truncf %9 : vector<64x128xf32> to vector<64x128xbf16>
    %c0_9 = arith.constant 0 : index
    %c0_10 = arith.constant 0 : index
    %c0_11 = arith.constant 0 : index
    %11 = vector.load %arg5[%c0_9, %c0_10, %c0_11] : memref<3x128x128xbf16, #tpu.memory_space<vmem>>, vector<1x128x128xbf16>
    %12 = vector.shape_cast %11 : vector<1x128x128xbf16> to vector<128x128xbf16>
    %cst_12 = arith.constant dense<0.000000e+00> : vector<64x128xf32>
    %13 = tpu.matmul %10, %12, %cst_12 {dimension_numbers = #tpu.dot_dimension_numbers<[1], [0], [0], [1], [0, 0, 1, 1], [], []>} : vector<64x128xbf16>, vector<128x128xbf16>, vector<64x128xf32> -> vector<64x128xf32>
    %c0_13 = arith.constant 0 : index
    %c0_14 = arith.constant 0 : index
    %c0_15 = arith.constant 0 : index
    %14 = vector.load %arg6[%c0_13, %c0_14, %c0_15] : memref<3x1x128xf32, #tpu.memory_space<vmem>>, vector<1x1x128xf32>
    %15 = vector.shape_cast %14 : vector<1x1x128xf32> to vector<1x128xf32>
    %16 = vector.broadcast %15 : vector<1x128xf32> to vector<64x128xf32>
    %17 = arith.addf %13, %16 : vector<64x128xf32>
    %18 = arith.mulf %17, %17 : vector<64x128xf32>
    %19 = arith.mulf %17, %18 : vector<64x128xf32>
    %cst_16 = arith.constant 4.471500e-02 : f32
    %20 = vector.broadcast %cst_16 : f32 to vector<64x128xf32>
    %21 = arith.mulf %20, %19 : vector<64x128xf32>
    %22 = arith.addf %17, %21 : vector<64x128xf32>
    %cst_17 = arith.constant 0.797884583 : f32
    %23 = vector.broadcast %cst_17 : f32 to vector<64x128xf32>
    %24 = arith.mulf %23, %22 : vector<64x128xf32>
    %25 = math.tanh %24 : vector<64x128xf32>
    %cst_18 = arith.constant 1.000000e+00 : f32
    %26 = vector.broadcast %cst_18 : f32 to vector<64x128xf32>
    %27 = arith.addf %26, %25 : vector<64x128xf32>
    %cst_19 = arith.constant 5.000000e-01 : f32
    %28 = vector.broadcast %cst_19 : f32 to vector<64x128xf32>
    %29 = arith.mulf %28, %27 : vector<64x128xf32>
    %30 = arith.mulf %17, %29 : vector<64x128xf32>
    %31 = arith.truncf %30 : vector<64x128xf32> to vector<64x128xbf16>
    %c0_20 = arith.constant 0 : index
    %c0_21 = arith.constant 0 : index
    %c0_22 = arith.constant 0 : index
    %32 = vector.load %arg7[%c0_20, %c0_21, %c0_22] : memref<3x128x128xbf16, #tpu.memory_space<vmem>>, vector<1x128x128xbf16>
    %33 = vector.shape_cast %32 : vector<1x128x128xbf16> to vector<128x128xbf16>
    %cst_23 = arith.constant dense<0.000000e+00> : vector<64x128xf32>
    %34 = tpu.matmul %31, %33, %cst_23 {dimension_numbers = #tpu.dot_dimension_numbers<[1], [0], [0], [1], [0, 0, 1, 1], [], []>} : vector<64x128xbf16>, vector<128x128xbf16>, vector<64x128xf32> -> vector<64x128xf32>
    %c0_24 = arith.constant 0 : index
    %c0_25 = arith.constant 0 : index
    %c0_26 = arith.constant 0 : index
    %35 = vector.load %arg8[%c0_24, %c0_25, %c0_26] : memref<3x1x128xf32, #tpu.memory_space<vmem>>, vector<1x1x128xf32>
    %36 = vector.shape_cast %35 : vector<1x1x128xf32> to vector<1x128xf32>
    %37 = vector.broadcast %36 : vector<1x128xf32> to vector<64x128xf32>
    %38 = arith.addf %34, %37 : vector<64x128xf32>
    %c0_27 = arith.constant 0 : index
    %c0_28 = arith.constant 0 : index
    %39 = vector.load %arg11[%c0_27, %c0_28] : memref<16x64xbf16, #tpu.memory_space<vmem>>, vector<16x64xbf16>
    %40 = arith.truncf %38 : vector<64x128xf32> to vector<64x128xbf16>
    %cst_29 = arith.constant dense<0.000000e+00> : vector<16x128xf32>
    %41 = tpu.matmul %39, %40, %cst_29 {dimension_numbers = #tpu.dot_dimension_numbers<[1], [0], [0], [1], [0, 0, 1, 1], [], []>} : vector<16x64xbf16>, vector<64x128xbf16>, vector<16x128xf32> -> vector<16x128xf32>
    %42 = arith.truncf %41 : vector<16x128xf32> to vector<16x128xbf16>
    %c1 = arith.constant 1 : index
    %c0_30 = arith.constant 0 : index
    %c0_31 = arith.constant 0 : index
    %43 = vector.load %arg5[%c1, %c0_30, %c0_31] : memref<3x128x128xbf16, #tpu.memory_space<vmem>>, vector<1x128x128xbf16>
    %44 = vector.shape_cast %43 : vector<1x128x128xbf16> to vector<128x128xbf16>
    %cst_32 = arith.constant dense<0.000000e+00> : vector<16x128xf32>
    %45 = tpu.matmul %42, %44, %cst_32 {dimension_numbers = #tpu.dot_dimension_numbers<[1], [0], [0], [1], [0, 0, 1, 1], [], []>} : vector<16x128xbf16>, vector<128x128xbf16>, vector<16x128xf32> -> vector<16x128xf32>
    %c1_33 = arith.constant 1 : index
    %c0_34 = arith.constant 0 : index
    %c0_35 = arith.constant 0 : index
    %46 = vector.load %arg6[%c1_33, %c0_34, %c0_35] : memref<3x1x128xf32, #tpu.memory_space<vmem>>, vector<1x1x128xf32>
    %47 = vector.shape_cast %46 : vector<1x1x128xf32> to vector<1x128xf32>
    %48 = vector.broadcast %47 : vector<1x128xf32> to vector<16x128xf32>
    %49 = arith.addf %45, %48 : vector<16x128xf32>
    %50 = arith.mulf %49, %49 : vector<16x128xf32>
    %51 = arith.mulf %49, %50 : vector<16x128xf32>
    %cst_36 = arith.constant 4.471500e-02 : f32
    %52 = vector.broadcast %cst_36 : f32 to vector<16x128xf32>
    %53 = arith.mulf %52, %51 : vector<16x128xf32>
    %54 = arith.addf %49, %53 : vector<16x128xf32>
    %cst_37 = arith.constant 0.797884583 : f32
    %55 = vector.broadcast %cst_37 : f32 to vector<16x128xf32>
    %56 = arith.mulf %55, %54 : vector<16x128xf32>
    %57 = math.tanh %56 : vector<16x128xf32>
    %cst_38 = arith.constant 1.000000e+00 : f32
    %58 = vector.broadcast %cst_38 : f32 to vector<16x128xf32>
    %59 = arith.addf %58, %57 : vector<16x128xf32>
    %cst_39 = arith.constant 5.000000e-01 : f32
    %60 = vector.broadcast %cst_39 : f32 to vector<16x128xf32>
    %61 = arith.mulf %60, %59 : vector<16x128xf32>
    %62 = arith.mulf %49, %61 : vector<16x128xf32>
    %63 = arith.truncf %62 : vector<16x128xf32> to vector<16x128xbf16>
    %c1_40 = arith.constant 1 : index
    %c0_41 = arith.constant 0 : index
    %c0_42 = arith.constant 0 : index
    %64 = vector.load %arg7[%c1_40, %c0_41, %c0_42] : memref<3x128x128xbf16, #tpu.memory_space<vmem>>, vector<1x128x128xbf16>
    %65 = vector.shape_cast %64 : vector<1x128x128xbf16> to vector<128x128xbf16>
    %cst_43 = arith.constant dense<0.000000e+00> : vector<16x128xf32>
    %66 = tpu.matmul %63, %65, %cst_43 {dimension_numbers = #tpu.dot_dimension_numbers<[1], [0], [0], [1], [0, 0, 1, 1], [], []>} : vector<16x128xbf16>, vector<128x128xbf16>, vector<16x128xf32> -> vector<16x128xf32>
    %c1_44 = arith.constant 1 : index
    %c0_45 = arith.constant 0 : index
    %c0_46 = arith.constant 0 : index
    %67 = vector.load %arg8[%c1_44, %c0_45, %c0_46] : memref<3x1x128xf32, #tpu.memory_space<vmem>>, vector<1x1x128xf32>
    %68 = vector.shape_cast %67 : vector<1x1x128xf32> to vector<1x128xf32>
    %69 = vector.broadcast %68 : vector<1x128xf32> to vector<16x128xf32>
    %70 = arith.addf %66, %69 : vector<16x128xf32>
    %71 = arith.truncf %70 : vector<16x128xf32> to vector<16x128xbf16>
    %c2 = arith.constant 2 : index
    %c0_47 = arith.constant 0 : index
    %c0_48 = arith.constant 0 : index
    %72 = vector.load %arg5[%c2, %c0_47, %c0_48] : memref<3x128x128xbf16, #tpu.memory_space<vmem>>, vector<1x128x128xbf16>
    %73 = vector.shape_cast %72 : vector<1x128x128xbf16> to vector<128x128xbf16>
    %cst_49 = arith.constant dense<0.000000e+00> : vector<16x128xf32>
    %74 = tpu.matmul %71, %73, %cst_49 {dimension_numbers = #tpu.dot_dimension_numbers<[1], [0], [0], [1], [0, 0, 1, 1], [], []>} : vector<16x128xbf16>, vector<128x128xbf16>, vector<16x128xf32> -> vector<16x128xf32>
    %c2_50 = arith.constant 2 : index
    %c0_51 = arith.constant 0 : index
    %c0_52 = arith.constant 0 : index
    %75 = vector.load %arg6[%c2_50, %c0_51, %c0_52] : memref<3x1x128xf32, #tpu.memory_space<vmem>>, vector<1x1x128xf32>
    %76 = vector.shape_cast %75 : vector<1x1x128xf32> to vector<1x128xf32>
    %77 = vector.broadcast %76 : vector<1x128xf32> to vector<16x128xf32>
    %78 = arith.addf %74, %77 : vector<16x128xf32>
    %79 = arith.mulf %78, %78 : vector<16x128xf32>
    %80 = arith.mulf %78, %79 : vector<16x128xf32>
    %cst_53 = arith.constant 4.471500e-02 : f32
    %81 = vector.broadcast %cst_53 : f32 to vector<16x128xf32>
    %82 = arith.mulf %81, %80 : vector<16x128xf32>
    %83 = arith.addf %78, %82 : vector<16x128xf32>
    %cst_54 = arith.constant 0.797884583 : f32
    %84 = vector.broadcast %cst_54 : f32 to vector<16x128xf32>
    %85 = arith.mulf %84, %83 : vector<16x128xf32>
    %86 = math.tanh %85 : vector<16x128xf32>
    %cst_55 = arith.constant 1.000000e+00 : f32
    %87 = vector.broadcast %cst_55 : f32 to vector<16x128xf32>
    %88 = arith.addf %87, %86 : vector<16x128xf32>
    %cst_56 = arith.constant 5.000000e-01 : f32
    %89 = vector.broadcast %cst_56 : f32 to vector<16x128xf32>
    %90 = arith.mulf %89, %88 : vector<16x128xf32>
    %91 = arith.mulf %78, %90 : vector<16x128xf32>
    %92 = arith.truncf %91 : vector<16x128xf32> to vector<16x128xbf16>
    %c2_57 = arith.constant 2 : index
    %c0_58 = arith.constant 0 : index
    %c0_59 = arith.constant 0 : index
    %93 = vector.load %arg7[%c2_57, %c0_58, %c0_59] : memref<3x128x128xbf16, #tpu.memory_space<vmem>>, vector<1x128x128xbf16>
    %94 = vector.shape_cast %93 : vector<1x128x128xbf16> to vector<128x128xbf16>
    %cst_60 = arith.constant dense<0.000000e+00> : vector<16x128xf32>
    %95 = tpu.matmul %92, %94, %cst_60 {dimension_numbers = #tpu.dot_dimension_numbers<[1], [0], [0], [1], [0, 0, 1, 1], [], []>} : vector<16x128xbf16>, vector<128x128xbf16>, vector<16x128xf32> -> vector<16x128xf32>
    %c2_61 = arith.constant 2 : index
    %c0_62 = arith.constant 0 : index
    %c0_63 = arith.constant 0 : index
    %96 = vector.load %arg8[%c2_61, %c0_62, %c0_63] : memref<3x1x128xf32, #tpu.memory_space<vmem>>, vector<1x1x128xf32>
    %97 = vector.shape_cast %96 : vector<1x1x128xf32> to vector<1x128xf32>
    %98 = vector.broadcast %97 : vector<1x128xf32> to vector<16x128xf32>
    %99 = arith.addf %95, %98 : vector<16x128xf32>
    %100 = arith.truncf %38 : vector<64x128xf32> to vector<64x128xbf16>
    %c0_64 = arith.constant 0 : index
    %c0_65 = arith.constant 0 : index
    %c0_66 = arith.constant 0 : index
    %101 = vector.load %arg9[%c0_64, %c0_65, %c0_66] : memref<3x128x128xbf16, #tpu.memory_space<vmem>>, vector<1x128x128xbf16>
    %102 = vector.shape_cast %101 : vector<1x128x128xbf16> to vector<128x128xbf16>
    %cst_67 = arith.constant dense<0.000000e+00> : vector<64x128xf32>
    %103 = tpu.matmul %100, %102, %cst_67 {dimension_numbers = #tpu.dot_dimension_numbers<[1], [0], [0], [1], [0, 0, 1, 1], [], []>} : vector<64x128xbf16>, vector<128x128xbf16>, vector<64x128xf32> -> vector<64x128xf32>
    %c0_68 = arith.constant 0 : index
    %c0_69 = arith.constant 0 : index
    %c0_70 = arith.constant 0 : index
    %104 = vector.load %arg10[%c0_68, %c0_69, %c0_70] : memref<3x1x128xf32, #tpu.memory_space<vmem>>, vector<1x1x128xf32>
    %105 = vector.shape_cast %104 : vector<1x1x128xf32> to vector<1x128xf32>
    %106 = vector.broadcast %105 : vector<1x128xf32> to vector<64x128xf32>
    %107 = arith.addf %103, %106 : vector<64x128xf32>
    %108 = arith.truncf %107 : vector<64x128xf32> to vector<64x128xbf16>
    %c0_71 = arith.constant 0 : index
    %c0_72 = arith.constant 0 : index
    %c0_73 = arith.constant 0 : index
    %109 = vector.load %arg12[%c0_71, %c0_72, %c0_73] : memref<1x64x128xbf16, #tpu.memory_space<vmem>>, vector<1x64x128xbf16>
    %110 = vector.shape_cast %109 : vector<1x64x128xbf16> to vector<64x128xbf16>
    %111 = vector.shape_cast %108 : vector<64x128xbf16> to vector<1x64x128xbf16>
    tpu.vector_store %arg12[%c0_71, %c0_72, %c0_73], %111 {strides = array<i32>} : memref<1x64x128xbf16, #tpu.memory_space<vmem>>, vector<1x64x128xbf16>,
    %112 = arith.truncf %70 : vector<16x128xf32> to vector<16x128xbf16>
    %c1_74 = arith.constant 1 : index
    %c0_75 = arith.constant 0 : index
    %c0_76 = arith.constant 0 : index
    %113 = vector.load %arg9[%c1_74, %c0_75, %c0_76] : memref<3x128x128xbf16, #tpu.memory_space<vmem>>, vector<1x128x128xbf16>
    %114 = vector.shape_cast %113 : vector<1x128x128xbf16> to vector<128x128xbf16>
    %cst_77 = arith.constant dense<0.000000e+00> : vector<16x128xf32>
    %115 = tpu.matmul %112, %114, %cst_77 {dimension_numbers = #tpu.dot_dimension_numbers<[1], [0], [0], [1], [0, 0, 1, 1], [], []>} : vector<16x128xbf16>, vector<128x128xbf16>, vector<16x128xf32> -> vector<16x128xf32>
    %c1_78 = arith.constant 1 : index
    %c0_79 = arith.constant 0 : index
    %c0_80 = arith.constant 0 : index
    %116 = vector.load %arg10[%c1_78, %c0_79, %c0_80] : memref<3x1x128xf32, #tpu.memory_space<vmem>>, vector<1x1x128xf32>
    %117 = vector.shape_cast %116 : vector<1x1x128xf32> to vector<1x128xf32>
    %118 = vector.broadcast %117 : vector<1x128xf32> to vector<16x128xf32>
    %119 = arith.addf %115, %118 : vector<16x128xf32>
    %120 = arith.truncf %119 : vector<16x128xf32> to vector<16x128xbf16>
    %c0_81 = arith.constant 0 : index
    %c0_82 = arith.constant 0 : index
    %c0_83 = arith.constant 0 : index
    %121 = vector.load %arg13[%c0_81, %c0_82, %c0_83] : memref<1x16x128xbf16, #tpu.memory_space<vmem>>, vector<1x16x128xbf16>
    %122 = vector.shape_cast %121 : vector<1x16x128xbf16> to vector<16x128xbf16>
    %123 = vector.shape_cast %120 : vector<16x128xbf16> to vector<1x16x128xbf16>
    tpu.vector_store %arg13[%c0_81, %c0_82, %c0_83], %123 {strides = array<i32>} : memref<1x16x128xbf16, #tpu.memory_space<vmem>>, vector<1x16x128xbf16>,
    %124 = arith.truncf %99 : vector<16x128xf32> to vector<16x128xbf16>
    %c2_84 = arith.constant 2 : index
    %c0_85 = arith.constant 0 : index
    %c0_86 = arith.constant 0 : index
    %125 = vector.load %arg9[%c2_84, %c0_85, %c0_86] : memref<3x128x128xbf16, #tpu.memory_space<vmem>>, vector<1x128x128xbf16>
    %126 = vector.shape_cast %125 : vector<1x128x128xbf16> to vector<128x128xbf16>
    %cst_87 = arith.constant dense<0.000000e+00> : vector<16x128xf32>
    %127 = tpu.matmul %124, %126, %cst_87 {dimension_numbers = #tpu.dot_dimension_numbers<[1], [0], [0], [1], [0, 0, 1, 1], [], []>} : vector<16x128xbf16>, vector<128x128xbf16>, vector<16x128xf32> -> vector<16x128xf32>
    %c2_88 = arith.constant 2 : index
    %c0_89 = arith.constant 0 : index
    %c0_90 = arith.constant 0 : index
    %128 = vector.load %arg10[%c2_88, %c0_89, %c0_90] : memref<3x1x128xf32, #tpu.memory_space<vmem>>, vector<1x1x128xf32>
    %129 = vector.shape_cast %128 : vector<1x1x128xf32> to vector<1x128xf32>
    %130 = vector.broadcast %129 : vector<1x128xf32> to vector<16x128xf32>
    %131 = arith.addf %127, %130 : vector<16x128xf32>
    %132 = arith.truncf %131 : vector<16x128xf32> to vector<16x128xbf16>
    %c0_91 = arith.constant 0 : index
    %c0_92 = arith.constant 0 : index
    %c0_93 = arith.constant 0 : index
    %133 = vector.load %arg14[%c0_91, %c0_92, %c0_93] : memref<1x16x128xbf16, #tpu.memory_space<vmem>>, vector<1x16x128xbf16>
    %134 = vector.shape_cast %133 : vector<1x16x128xbf16> to vector<16x128xbf16>
    %135 = vector.shape_cast %132 : vector<16x128xbf16> to vector<1x16x128xbf16>
    tpu.vector_store %arg14[%c0_91, %c0_92, %c0_93], %135 {strides = array<i32>} : memref<1x16x128xbf16, #tpu.memory_space<vmem>>, vector<1x16x128xbf16>,
    return
  }
  func.func @transform_0(%arg0: i32) -> (i32, i32, i32) {
    %c0_i32 = arith.constant 0 : i32
    %c0_i32_0 = arith.constant 0 : i32
    %c0_i32_1 = arith.constant 0 : i32
    return %arg0, %c0_i32, %c0_i32_0 : i32, i32, i32
  }
  func.func @transform_1(%arg0: i32) -> (i32, i32, i32) {
    %c0_i32 = arith.constant 0 : i32
    %c0_i32_0 = arith.constant 0 : i32
    %c0_i32_1 = arith.constant 0 : i32
    %c0_i32_2 = arith.constant 0 : i32
    return %c0_i32, %c0_i32_0, %c0_i32_1 : i32, i32, i32
  }
  func.func @transform_2(%arg0: i32) -> (i32, i32) {
    %c0_i32 = arith.constant 0 : i32
    %c0_i32_0 = arith.constant 0 : i32
    %c0_i32_1 = arith.constant 0 : i32
    return %c0_i32, %c0_i32_0 : i32, i32
  }
  func.func @transform_3(%arg0: i32) -> (i32, i32) {
    %c0_i32 = arith.constant 0 : i32
    %c0_i32_0 = arith.constant 0 : i32
    %c0_i32_1 = arith.constant 0 : i32
    return %c0_i32, %c0_i32_0 : i32, i32
  }
  func.func @transform_4(%arg0: i32) -> (i32, i32, i32) {
    %c0_i32 = arith.constant 0 : i32
    %c0_i32_0 = arith.constant 0 : i32
    %c0_i32_1 = arith.constant 0 : i32
    %c0_i32_2 = arith.constant 0 : i32
    return %c0_i32, %c0_i32_0, %c0_i32_1 : i32, i32, i32
  }
  func.func @transform_5(%arg0: i32) -> (i32, i32, i32) {
    %c0_i32 = arith.constant 0 : i32
    %c0_i32_0 = arith.constant 0 : i32
    %c0_i32_1 = arith.constant 0 : i32
    %c0_i32_2 = arith.constant 0 : i32
    return %c0_i32, %c0_i32_0, %c0_i32_1 : i32, i32, i32
  }
  func.func @transform_6(%arg0: i32) -> (i32, i32, i32) {
    %c0_i32 = arith.constant 0 : i32
    %c0_i32_0 = arith.constant 0 : i32
    %c0_i32_1 = arith.constant 0 : i32
    %c0_i32_2 = arith.constant 0 : i32
    return %c0_i32, %c0_i32_0, %c0_i32_1 : i32, i32, i32
  }
  func.func @transform_7(%arg0: i32) -> (i32, i32, i32) {
    %c0_i32 = arith.constant 0 : i32
    %c0_i32_0 = arith.constant 0 : i32
    %c0_i32_1 = arith.constant 0 : i32
    %c0_i32_2 = arith.constant 0 : i32
    return %c0_i32, %c0_i32_0, %c0_i32_1 : i32, i32, i32
  }
  func.func @transform_8(%arg0: i32) -> (i32, i32, i32) {
    %c0_i32 = arith.constant 0 : i32
    %c0_i32_0 = arith.constant 0 : i32
    %c0_i32_1 = arith.constant 0 : i32
    %c0_i32_2 = arith.constant 0 : i32
    return %c0_i32, %c0_i32_0, %c0_i32_1 : i32, i32, i32
  }
  func.func @transform_9(%arg0: i32) -> (i32, i32, i32) {
    %c0_i32 = arith.constant 0 : i32
    %c0_i32_0 = arith.constant 0 : i32
    %c0_i32_1 = arith.constant 0 : i32
    %c0_i32_2 = arith.constant 0 : i32
    return %c0_i32, %c0_i32_0, %c0_i32_1 : i32, i32, i32
  }
  func.func @transform_10(%arg0: i32) -> (i32, i32) {
    %c0_i32 = arith.constant 0 : i32
    %c0_i32_0 = arith.constant 0 : i32
    %c0_i32_1 = arith.constant 0 : i32
    return %c0_i32, %c0_i32_0 : i32, i32
  }
  func.func @transform_11(%arg0: i32) -> (i32, i32, i32) {
    %c0_i32 = arith.constant 0 : i32
    %c0_i32_0 = arith.constant 0 : i32
    %c0_i32_1 = arith.constant 0 : i32
    return %arg0, %c0_i32, %c0_i32_0 : i32, i32, i32
  }
  func.func @transform_12(%arg0: i32) -> (i32, i32, i32) {
    %c0_i32 = arith.constant 0 : i32
    %c0_i32_0 = arith.constant 0 : i32
    %c0_i32_1 = arith.constant 0 : i32
    return %arg0, %c0_i32, %c0_i32_0 : i32, i32, i32
  }
  func.func @transform_13(%arg0: i32) -> (i32, i32, i32) {
    %c0_i32 = arith.constant 0 : i32
    %c0_i32_0 = arith.constant 0 : i32
    %c0_i32_1 = arith.constant 0 : i32
    return %arg0, %c0_i32, %c0_i32_0 : i32, i32, i32
  }
}

module attributes {stable_mosaic.version = 11 : i64} {
  func.func @_decoder_kernel(%arg0: i32, %arg1: memref<1x1x128xf32, #tpu.memory_space<vmem>>, %arg2: memref<1x16x128xbf16, #tpu.memory_space<vmem>>, %arg3: memref<1x16x128xbf16, #tpu.memory_space<vmem>>, %arg4: memref<1x64x128xbf16, #tpu.memory_space<vmem>>, %arg5: memref<64x16xbf16, #tpu.memory_space<vmem>>, %arg6: memref<128x128xbf16, #tpu.memory_space<vmem>>, %arg7: memref<1x128xf32, #tpu.memory_space<vmem>>, %arg8: memref<128x128xbf16, #tpu.memory_space<vmem>>, %arg9: memref<1x128xf32, #tpu.memory_space<vmem>>, %arg10: memref<128x128xbf16, #tpu.memory_space<vmem>>, %arg11: memref<1x128xf32, #tpu.memory_space<vmem>>, %arg12: memref<128x128xbf16, #tpu.memory_space<vmem>>, %arg13: memref<1x128xf32, #tpu.memory_space<vmem>>, %arg14: memref<1x1x64xf32, #tpu.memory_space<vmem>>) attributes {dimension_semantics = [#tpu.dimension_semantics<parallel>], iteration_bounds = array<i64: 2>, scalar_prefetch = 0 : i64, scratch_operands = 0 : i64, tpu.core_type = #tpu.core_type<tc>, window_params = [{transform_indices = @transform_0, window_bounds = array<i64: 1, 1, 128>}, {transform_indices = @transform_1, window_bounds = array<i64: 1, 16, 128>}, {transform_indices = @transform_2, window_bounds = array<i64: 1, 16, 128>}, {transform_indices = @transform_3, window_bounds = array<i64: 1, 64, 128>}, {pipeline_mode = #tpu.pipeline_mode<synchronous>, transform_indices = @transform_4, window_bounds = array<i64: 64, 16>}, {pipeline_mode = #tpu.pipeline_mode<synchronous>, transform_indices = @transform_5, window_bounds = array<i64: 128, 128>}, {pipeline_mode = #tpu.pipeline_mode<synchronous>, transform_indices = @transform_6, window_bounds = array<i64: 1, 128>}, {pipeline_mode = #tpu.pipeline_mode<synchronous>, transform_indices = @transform_7, window_bounds = array<i64: 128, 128>}, {pipeline_mode = #tpu.pipeline_mode<synchronous>, transform_indices = @transform_8, window_bounds = array<i64: 1, 128>}, {pipeline_mode = #tpu.pipeline_mode<synchronous>, transform_indices = @transform_9, window_bounds = array<i64: 128, 128>}, {pipeline_mode = #tpu.pipeline_mode<synchronous>, transform_indices = @transform_10, window_bounds = array<i64: 1, 128>}, {pipeline_mode = #tpu.pipeline_mode<synchronous>, transform_indices = @transform_11, window_bounds = array<i64: 128, 128>}, {pipeline_mode = #tpu.pipeline_mode<synchronous>, transform_indices = @transform_12, window_bounds = array<i64: 1, 128>}, {transform_indices = @transform_13, window_bounds = array<i64: 1, 1, 64>}]} {
    %c0 = arith.constant 0 : index
    %c0_0 = arith.constant 0 : index
    %c0_1 = arith.constant 0 : index
    %0 = vector.load %arg1[%c0, %c0_0, %c0_1] : memref<1x1x128xf32, #tpu.memory_space<vmem>>, vector<1x1x128xf32>
    %1 = vector.shape_cast %0 : vector<1x1x128xf32> to vector<1x128xf32>
    %2 = arith.truncf %1 : vector<1x128xf32> to vector<1x128xbf16>
    %c0_2 = arith.constant 0 : index
    %c0_3 = arith.constant 0 : index
    %3 = vector.load %arg6[%c0_2, %c0_3] : memref<128x128xbf16, #tpu.memory_space<vmem>>, vector<128x128xbf16>
    %cst = arith.constant dense<0.000000e+00> : vector<1x128xf32>
    %4 = tpu.matmul %2, %3, %cst {dimension_numbers = #tpu.dot_dimension_numbers<[1], [0], [0], [1], [0, 0, 1, 1], [], []>} : vector<1x128xbf16>, vector<128x128xbf16>, vector<1x128xf32> -> vector<1x128xf32>
    %c0_4 = arith.constant 0 : index
    %c0_5 = arith.constant 0 : index
    %5 = vector.load %arg7[%c0_4, %c0_5] : memref<1x128xf32, #tpu.memory_space<vmem>>, vector<1x128xf32>
    %6 = arith.addf %4, %5 : vector<1x128xf32>
    %7 = arith.mulf %6, %6 : vector<1x128xf32>
    %8 = arith.mulf %6, %7 : vector<1x128xf32>
    %cst_6 = arith.constant 4.471500e-02 : f32
    %9 = vector.broadcast %cst_6 : f32 to vector<1x128xf32>
    %10 = arith.mulf %9, %8 : vector<1x128xf32>
    %11 = arith.addf %6, %10 : vector<1x128xf32>
    %cst_7 = arith.constant 0.797884583 : f32
    %12 = vector.broadcast %cst_7 : f32 to vector<1x128xf32>
    %13 = arith.mulf %12, %11 : vector<1x128xf32>
    %14 = math.tanh %13 : vector<1x128xf32>
    %cst_8 = arith.constant 1.000000e+00 : f32
    %15 = vector.broadcast %cst_8 : f32 to vector<1x128xf32>
    %16 = arith.addf %15, %14 : vector<1x128xf32>
    %cst_9 = arith.constant 5.000000e-01 : f32
    %17 = vector.broadcast %cst_9 : f32 to vector<1x128xf32>
    %18 = arith.mulf %17, %16 : vector<1x128xf32>
    %19 = arith.mulf %6, %18 : vector<1x128xf32>
    %20 = arith.truncf %19 : vector<1x128xf32> to vector<1x128xbf16>
    %c0_10 = arith.constant 0 : index
    %c0_11 = arith.constant 0 : index
    %21 = vector.load %arg8[%c0_10, %c0_11] : memref<128x128xbf16, #tpu.memory_space<vmem>>, vector<128x128xbf16>
    %cst_12 = arith.constant dense<0.000000e+00> : vector<1x128xf32>
    %22 = tpu.matmul %20, %21, %cst_12 {dimension_numbers = #tpu.dot_dimension_numbers<[1], [0], [0], [1], [0, 0, 1, 1], [], []>} : vector<1x128xbf16>, vector<128x128xbf16>, vector<1x128xf32> -> vector<1x128xf32>
    %c0_13 = arith.constant 0 : index
    %c0_14 = arith.constant 0 : index
    %23 = vector.load %arg9[%c0_13, %c0_14] : memref<1x128xf32, #tpu.memory_space<vmem>>, vector<1x128xf32>
    %24 = arith.addf %22, %23 : vector<1x128xf32>
    %c0_15 = arith.constant 0 : index
    %c0_16 = arith.constant 0 : index
    %c0_17 = arith.constant 0 : index
    %25 = vector.load %arg2[%c0_15, %c0_16, %c0_17] : memref<1x16x128xbf16, #tpu.memory_space<vmem>>, vector<1x16x128xbf16>
    %26 = vector.shape_cast %25 : vector<1x16x128xbf16> to vector<16x128xbf16>
    %c0_18 = arith.constant 0 : index
    %c0_19 = arith.constant 0 : index
    %27 = vector.load %arg10[%c0_18, %c0_19] : memref<128x128xbf16, #tpu.memory_space<vmem>>, vector<128x128xbf16>
    %cst_20 = arith.constant dense<0.000000e+00> : vector<16x128xf32>
    %28 = tpu.matmul %26, %27, %cst_20 {dimension_numbers = #tpu.dot_dimension_numbers<[1], [0], [0], [1], [0, 0, 1, 1], [], []>} : vector<16x128xbf16>, vector<128x128xbf16>, vector<16x128xf32> -> vector<16x128xf32>
    %c0_21 = arith.constant 0 : index
    %c0_22 = arith.constant 0 : index
    %29 = vector.load %arg11[%c0_21, %c0_22] : memref<1x128xf32, #tpu.memory_space<vmem>>, vector<1x128xf32>
    %30 = vector.broadcast %29 : vector<1x128xf32> to vector<16x128xf32>
    %31 = arith.addf %28, %30 : vector<16x128xf32>
    %c0_23 = arith.constant 0 : index
    %c0_24 = arith.constant 0 : index
    %c0_25 = arith.constant 0 : index
    %32 = vector.load %arg3[%c0_23, %c0_24, %c0_25] : memref<1x16x128xbf16, #tpu.memory_space<vmem>>, vector<1x16x128xbf16>
    %33 = vector.shape_cast %32 : vector<1x16x128xbf16> to vector<16x128xbf16>
    %34 = arith.extf %33 : vector<16x128xbf16> to vector<16x128xf32>
    %35 = arith.addf %31, %34 : vector<16x128xf32>
    %36 = arith.mulf %35, %35 : vector<16x128xf32>
    %37 = arith.mulf %35, %36 : vector<16x128xf32>
    %cst_26 = arith.constant 4.471500e-02 : f32
    %38 = vector.broadcast %cst_26 : f32 to vector<16x128xf32>
    %39 = arith.mulf %38, %37 : vector<16x128xf32>
    %40 = arith.addf %35, %39 : vector<16x128xf32>
    %cst_27 = arith.constant 0.797884583 : f32
    %41 = vector.broadcast %cst_27 : f32 to vector<16x128xf32>
    %42 = arith.mulf %41, %40 : vector<16x128xf32>
    %43 = math.tanh %42 : vector<16x128xf32>
    %cst_28 = arith.constant 1.000000e+00 : f32
    %44 = vector.broadcast %cst_28 : f32 to vector<16x128xf32>
    %45 = arith.addf %44, %43 : vector<16x128xf32>
    %cst_29 = arith.constant 5.000000e-01 : f32
    %46 = vector.broadcast %cst_29 : f32 to vector<16x128xf32>
    %47 = arith.mulf %46, %45 : vector<16x128xf32>
    %48 = arith.mulf %35, %47 : vector<16x128xf32>
    %c0_30 = arith.constant 0 : index
    %c0_31 = arith.constant 0 : index
    %49 = vector.load %arg5[%c0_30, %c0_31] : memref<64x16xbf16, #tpu.memory_space<vmem>>, vector<64x16xbf16>
    %50 = arith.truncf %48 : vector<16x128xf32> to vector<16x128xbf16>
    %cst_32 = arith.constant dense<0.000000e+00> : vector<64x128xf32>
    %51 = tpu.matmul %49, %50, %cst_32 {dimension_numbers = #tpu.dot_dimension_numbers<[1], [0], [0], [1], [0, 0, 1, 1], [], []>} : vector<64x16xbf16>, vector<16x128xbf16>, vector<64x128xf32> -> vector<64x128xf32>
    %52 = arith.truncf %51 : vector<64x128xf32> to vector<64x128xbf16>
    %c0_33 = arith.constant 0 : index
    %c0_34 = arith.constant 0 : index
    %53 = vector.load %arg12[%c0_33, %c0_34] : memref<128x128xbf16, #tpu.memory_space<vmem>>, vector<128x128xbf16>
    %cst_35 = arith.constant dense<0.000000e+00> : vector<64x128xf32>
    %54 = tpu.matmul %52, %53, %cst_35 {dimension_numbers = #tpu.dot_dimension_numbers<[1], [0], [0], [1], [0, 0, 1, 1], [], []>} : vector<64x128xbf16>, vector<128x128xbf16>, vector<64x128xf32> -> vector<64x128xf32>
    %c0_36 = arith.constant 0 : index
    %c0_37 = arith.constant 0 : index
    %55 = vector.load %arg13[%c0_36, %c0_37] : memref<1x128xf32, #tpu.memory_space<vmem>>, vector<1x128xf32>
    %56 = vector.broadcast %55 : vector<1x128xf32> to vector<64x128xf32>
    %57 = arith.addf %54, %56 : vector<64x128xf32>
    %c0_38 = arith.constant 0 : index
    %c0_39 = arith.constant 0 : index
    %c0_40 = arith.constant 0 : index
    %58 = vector.load %arg4[%c0_38, %c0_39, %c0_40] : memref<1x64x128xbf16, #tpu.memory_space<vmem>>, vector<1x64x128xbf16>
    %59 = vector.shape_cast %58 : vector<1x64x128xbf16> to vector<64x128xbf16>
    %60 = arith.extf %59 : vector<64x128xbf16> to vector<64x128xf32>
    %61 = arith.addf %57, %60 : vector<64x128xf32>
    %62 = arith.mulf %61, %61 : vector<64x128xf32>
    %63 = arith.mulf %61, %62 : vector<64x128xf32>
    %cst_41 = arith.constant 4.471500e-02 : f32
    %64 = vector.broadcast %cst_41 : f32 to vector<64x128xf32>
    %65 = arith.mulf %64, %63 : vector<64x128xf32>
    %66 = arith.addf %61, %65 : vector<64x128xf32>
    %cst_42 = arith.constant 0.797884583 : f32
    %67 = vector.broadcast %cst_42 : f32 to vector<64x128xf32>
    %68 = arith.mulf %67, %66 : vector<64x128xf32>
    %69 = math.tanh %68 : vector<64x128xf32>
    %cst_43 = arith.constant 1.000000e+00 : f32
    %70 = vector.broadcast %cst_43 : f32 to vector<64x128xf32>
    %71 = arith.addf %70, %69 : vector<64x128xf32>
    %cst_44 = arith.constant 5.000000e-01 : f32
    %72 = vector.broadcast %cst_44 : f32 to vector<64x128xf32>
    %73 = arith.mulf %72, %71 : vector<64x128xf32>
    %74 = arith.mulf %61, %73 : vector<64x128xf32>
    %75 = vector.broadcast %24 : vector<1x128xf32> to vector<64x128xf32>
    %76 = arith.mulf %74, %75 : vector<64x128xf32>
    %cst_45 = arith.constant dense<0.000000e+00> : vector<64xf32>
    %77 = vector.multi_reduction <add>, %76, %cst_45 [1] : vector<64x128xf32> to vector<64xf32>
    %c0_46 = arith.constant 0 : index
    %c0_47 = arith.constant 0 : index
    %c0_48 = arith.constant 0 : index
    %78 = vector.load %arg14[%c0_46, %c0_47, %c0_48] : memref<1x1x64xf32, #tpu.memory_space<vmem>>, vector<1x1x64xf32>
    %79 = vector.shape_cast %78 : vector<1x1x64xf32> to vector<64xf32>
    %80 = vector.shape_cast %77 : vector<64xf32> to vector<1x1x64xf32>
    tpu.vector_store %arg14[%c0_46, %c0_47, %c0_48], %80 {strides = array<i32>} : memref<1x1x64xf32, #tpu.memory_space<vmem>>, vector<1x1x64xf32>,
    return
  }
  func.func @transform_0(%arg0: i32) -> (i32, i32, i32) {
    %c0_i32 = arith.constant 0 : i32
    %c0_i32_0 = arith.constant 0 : i32
    %c0_i32_1 = arith.constant 0 : i32
    return %arg0, %c0_i32, %c0_i32_0 : i32, i32, i32
  }
  func.func @transform_1(%arg0: i32) -> (i32, i32, i32) {
    %c0_i32 = arith.constant 0 : i32
    %c0_i32_0 = arith.constant 0 : i32
    %c0_i32_1 = arith.constant 0 : i32
    return %arg0, %c0_i32, %c0_i32_0 : i32, i32, i32
  }
  func.func @transform_2(%arg0: i32) -> (i32, i32, i32) {
    %c0_i32 = arith.constant 0 : i32
    %c0_i32_0 = arith.constant 0 : i32
    %c0_i32_1 = arith.constant 0 : i32
    return %arg0, %c0_i32, %c0_i32_0 : i32, i32, i32
  }
  func.func @transform_3(%arg0: i32) -> (i32, i32, i32) {
    %c0_i32 = arith.constant 0 : i32
    %c0_i32_0 = arith.constant 0 : i32
    %c0_i32_1 = arith.constant 0 : i32
    return %arg0, %c0_i32, %c0_i32_0 : i32, i32, i32
  }
  func.func @transform_4(%arg0: i32) -> (i32, i32) {
    %c0_i32 = arith.constant 0 : i32
    %c0_i32_0 = arith.constant 0 : i32
    %c0_i32_1 = arith.constant 0 : i32
    return %c0_i32, %c0_i32_0 : i32, i32
  }
  func.func @transform_5(%arg0: i32) -> (i32, i32) {
    %c0_i32 = arith.constant 0 : i32
    %c0_i32_0 = arith.constant 0 : i32
    %c0_i32_1 = arith.constant 0 : i32
    return %c0_i32, %c0_i32_0 : i32, i32
  }
  func.func @transform_6(%arg0: i32) -> (i32, i32) {
    %c0_i32 = arith.constant 0 : i32
    %c0_i32_0 = arith.constant 0 : i32
    %c0_i32_1 = arith.constant 0 : i32
    return %c0_i32, %c0_i32_0 : i32, i32
  }
  func.func @transform_7(%arg0: i32) -> (i32, i32) {
    %c0_i32 = arith.constant 0 : i32
    %c0_i32_0 = arith.constant 0 : i32
    %c0_i32_1 = arith.constant 0 : i32
    return %c0_i32, %c0_i32_0 : i32, i32
  }
  func.func @transform_8(%arg0: i32) -> (i32, i32) {
    %c0_i32 = arith.constant 0 : i32
    %c0_i32_0 = arith.constant 0 : i32
    %c0_i32_1 = arith.constant 0 : i32
    return %c0_i32, %c0_i32_0 : i32, i32
  }
  func.func @transform_9(%arg0: i32) -> (i32, i32) {
    %c0_i32 = arith.constant 0 : i32
    %c0_i32_0 = arith.constant 0 : i32
    %c0_i32_1 = arith.constant 0 : i32
    return %c0_i32, %c0_i32_0 : i32, i32
  }
  func.func @transform_10(%arg0: i32) -> (i32, i32) {
    %c0_i32 = arith.constant 0 : i32
    %c0_i32_0 = arith.constant 0 : i32
    %c0_i32_1 = arith.constant 0 : i32
    return %c0_i32, %c0_i32_0 : i32, i32
  }
  func.func @transform_11(%arg0: i32) -> (i32, i32) {
    %c0_i32 = arith.constant 0 : i32
    %c0_i32_0 = arith.constant 0 : i32
    %c0_i32_1 = arith.constant 0 : i32
    return %c0_i32, %c0_i32_0 : i32, i32
  }
  func.func @transform_12(%arg0: i32) -> (i32, i32) {
    %c0_i32 = arith.constant 0 : i32
    %c0_i32_0 = arith.constant 0 : i32
    %c0_i32_1 = arith.constant 0 : i32
    return %c0_i32, %c0_i32_0 : i32, i32
  }
  func.func @transform_13(%arg0: i32) -> (i32, i32, i32) {
    %c0_i32 = arith.constant 0 : i32
    %c0_i32_0 = arith.constant 0 : i32
    %c0_i32_1 = arith.constant 0 : i32
    return %arg0, %c0_i32, %c0_i32_0 : i32, i32, i32
  }
}

</mosaic_0001>

<bundles_post_ra>
// kernel: promptable_sam2_forward.2
= control target key start
LH: loop header
LB: loop body
LE: loop exit
PB: predicated region body
PF: predicated region fallthrough
CT: control target
= control target key end

     0   :  { %s2909_s25 = smov 0   ;;  %s3371_s0 = inlined_call_operand.vmem [shape: bf16[2,64,128], index: 0, kind: input, shape index: {}]   ;;  %s3372_s1 = inlined_call_operand.vmem [shape: f32[1,64,128], index: 1, kind: input, shape index: {}]   ;;  %s3373_s2 = inlined_call_operand.vmem [shape: bf16[128,128], index: 2, kind: input, shape index: {}]   ;;  %s3374_s3 = inlined_call_operand.vmem [shape: f32[1,128], index: 3, kind: input, shape index: {}]   ;;  %s3375_s4 = inlined_call_operand.vmem [shape: bf16[3,128,128], index: 4, kind: input, shape index: {}]   ;;  %s3376_s5 = inlined_call_operand.vmem [shape: f32[3,1,128], index: 5, kind: input, shape index: {}]   ;;  %s3377_s6 = inlined_call_operand.vmem [shape: bf16[3,128,128], index: 6, kind: input, shape index: {}]   ;;  %s3378_s7 = inlined_call_operand.vmem [shape: f32[3,1,128], index: 7, kind: input, shape index: {}]   ;;  %s3379_s8 = inlined_call_operand.vmem [shape: bf16[3,128,128], index: 8, kind: input, shape index: {}]   ;;  %s3380_s9 = inlined_call_operand.vmem [shape: f32[3,1,128], index: 9, kind: input, shape index: {}]   ;;  %s3381_s10 = inlined_call_operand.vmem [shape: bf16[16,64], index: 10, kind: input, shape index: {}]   ;;  %s3382_s11 = inlined_call_operand.vmem [shape: bf16[2,64,128], index: 11, kind: output, shape index: {0}]   ;;  %s3383_s12 = inlined_call_operand.vmem [shape: bf16[2,16,128], index: 12, kind: output, shape index: {1}]   ;;  %s3384_s13 = inlined_call_operand.vmem [shape: bf16[2,16,128], index: 13, kind: output, shape index: {2}]  }
   0x1 LB: > { %s2101_s26 = sadd.s32 4294967295, %s2835_s25   ;;  %p2105_p0 = scmp.ge.s32.totalorder %s2835_s25, 1  ;;  %s2835_s25 = sphi %s2909_s25, %s24_s25  }
   0x2   : > { %p392_p1 = scmp.lt.s32.totalorder %s2835_s25, 3 }
   0x4   : > { %p393_p2 = pnand %p2105_p0, %p392_p1 }
   0x5   : > { %p446_p3 = scmp.lt.s32.totalorder (!%p393_p2), %s2101_s26, 1 }
   0x6   : > { %396 = sbr.rel (%p393_p2) target bundleno = 1973 (0x7b5), region = 64 }
   0xb   : > { %v2720_v0 = vld [vmem:[%s3373_s2 + $0x38] sm:$0xff]   ;;  %v2721_v1 = vld [vmem:[%s3373_s2 + $0x30] sm:$0xff]   ;;  %s3386_s26 = smov (!%p446_p3, %s2101_s26), 1  ;;  %v2722_v2 = vld [vmem:[%s3373_s2 + $0x28] sm:$0xff]   ;;  %vm2838_vm0 = vmmov 0   ;;  %vm1014_vm1 = vcmask 523264  }
   0xc   : > { %2482 = vmatprep.subr.bf16.mxu0 %v2720_v0  ;;  %s2326_s16 = sshll.u32 %s3386_s26, 5  ;;  %v2723_v3 = vld [vmem:[%s3373_s2 + $0x20] sm:$0xff]   ;;  %v2724_v5 = vld [vmem:[%s3373_s2 + $0x18] sm:$0xff]   ;;  %v2733_v7 = vld [vmem:[%s3375_s4 + $0x30] sm:$0xff]   ;;  %s2328_s15 = sshll.u32 %s3386_s26, 3 }
   0xd   : > { %2483 = vmatpush3.bf16.msra.mxu0 %v2720_v0  ;;  %s2934_s19 = scalar_lea.vmem %s3371_s0, %s2326_s16  ;;  %v2732_v6 = vld [vmem:[%s3375_s4 + $0x38] sm:$0xff]   ;;  %v2725_v8 = vld [vmem:[%s3373_s2 + $0x10] sm:$0xff]   ;;  %v2734_v9 = vld [vmem:[%s3375_s4 + $0x28] sm:$0xff]   ;;  %s455_s23 = scalar_lea.vmem %s3382_s11, %s2326_s16 }
   0xe   : > { %2484 = vmatprep.subr.bf16.mxu0 %v2721_v1  ;;  %v2728_v4 = vld [vmem:[%s2934_s19] sm:$0xff]   ;;  %2506 = vmatprep.subr.bf16.mxu1 %v2732_v6  ;;  %v2726_v10 = vld [vmem:[%s3373_s2 + $0x8] sm:$0xff]   ;;  %v2736_v13 = vld [vmem:[%s3375_s4 + $0x18] sm:$0xff]  }
   0xf   : > { %2498 = vmatprep.mubr.bf16.mxu0 %v2728_v4  ;;  %2507 = vmatpush3.bf16.msra.mxu1 %v2732_v6  ;;  %v2735_v11 = vld [vmem:[%s3375_s4 + $0x20] sm:$0xff]   ;;  %v2729_v14 = vld [vmem:[%s2934_s19 + $0x8] sm:$0xff]   ;;  %v2730_v15 = vld [vmem:[%s2934_s19 + $0x10] sm:$0xff]  }
  0x10   : > { %2508 = vmatprep.subr.bf16.mxu1 %v2733_v7  ;;  %v2727_v12 = vld [vmem:[%s3373_s2] sm:$0xff]   ;;  %v2731_v16 = vld [vmem:[%s2934_s19 + $0x18] sm:$0xff]   ;;  %v2737_v17 = vld [vmem:[%s3375_s4 + $0x10] sm:$0xff]   ;;  %s460_s19 = scalar_lea.vmem %s3383_s12, %s2328_s15 }
  0x11   : > { %2485 = vmatpush3.bf16.msra.mxu0 %v2721_v1  ;;  %v2738_v18 = vld [vmem:[%s3375_s4 + $0x8] sm:$0xff]   ;;  %v2739_v19 = vld [vmem:[%s3375_s4] sm:$0xff]   ;;  %v638_v26 = vld [vmem:[%s3372_s1 + $0x18] sm:$0xff] }
  0x12   : > { %2486 = vmatprep.subr.bf16.mxu0 %v2722_v2  ;;  %v2114_v22 = vld [vmem:[%s3374_s3] ss:$0 sm:$0xff]  ;;  %v636_v30 = vld [vmem:[%s3372_s1 + $0x8] sm:$0xff]  ;;  %v637_v31 = vld [vmem:[%s3372_s1 + $0x10] sm:$0xff] }
  0x13   : > { %2509 = vmatpush3.bf16.msra.mxu1 %v2733_v7  ;;  %v635_v29 = vld [vmem:[%s3372_s1] sm:$0xff]  ;;  %v642_v44 = vld [vmem:[%s3372_s1 + $0x38] sm:$0xff]  ;;  %v640_v48 = vld [vmem:[%s3372_s1 + $0x28] sm:$0xff] }
  0x14   : > { %2510 = vmatprep.subr.bf16.mxu1 %v2734_v9  ;;  %v639_v46 = vld [vmem:[%s3372_s1 + $0x20] sm:$0xff]  ;;  %v641_v49 = vld [vmem:[%s3372_s1 + $0x30] sm:$0xff]  ;;  %v2740_v57 = vld [vmem:[%s3377_s6 + $0x38] sm:$0xff]  }
  0x15   : > { %2487 = vmatpush3.bf16.msra.mxu0 %v2722_v2  ;;  %v2741_v58 = vld [vmem:[%s3377_s6 + $0x30] sm:$0xff]   ;;  %v2742_v59 = vld [vmem:[%s3377_s6 + $0x28] sm:$0xff]   ;;  %v2743_v60 = vld [vmem:[%s3377_s6 + $0x20] sm:$0xff]  }
  0x16   : > { %2488 = vmatprep.subr.bf16.mxu0 %v2723_v3  ;;  %v2744_v61 = vld [vmem:[%s3377_s6 + $0x18] sm:$0xff]   ;;  %v2745_v62 = vld [vmem:[%s3377_s6 + $0x10] sm:$0xff]   ;;  %v2746_v63 = vld [vmem:[%s3377_s6 + $0x8] sm:$0xff]  }
  0x17   : > { %2511 = vmatpush3.bf16.msra.mxu1 %v2734_v9  ;;  %v2747_v0 = vld [vmem:[%s3377_s6] sm:$0xff]  }
  0x18   : > { %2512 = vmatprep.subr.bf16.mxu1 %v2735_v11  ;;  %v2127_v1 = vld [vmem:[%s3376_s5] ss:$0 sm:$0xff] }
  0x19   : > { %2489 = vmatpush3.bf16.msra.mxu0 %v2723_v3 }
  0x1a   : > { %2490 = vmatprep.subr.bf16.mxu0 %v2724_v5 }
  0x1b   : > { %2513 = vmatpush3.bf16.msra.mxu1 %v2735_v11 }
  0x1c   : > { %2514 = vmatprep.subr.bf16.mxu1 %v2736_v13 }
  0x1d   : > { %2491 = vmatpush3.bf16.msra.mxu0 %v2724_v5 }
  0x1e   : > { %2492 = vmatprep.subr.bf16.mxu0 %v2725_v8 }
  0x1f   : > { %2515 = vmatpush3.bf16.msra.mxu1 %v2736_v13 }
  0x20   : > { %2516 = vmatprep.subr.bf16.mxu1 %v2737_v17 }
  0x21   : > { %2493 = vmatpush3.bf16.msra.mxu0 %v2725_v8 }
  0x22   : > { %2494 = vmatprep.subr.bf16.mxu0 %v2726_v10 }
  0x23   : > { %2517 = vmatpush3.bf16.msra.mxu1 %v2737_v17 }
  0x24   : > { %2518 = vmatprep.subr.bf16.mxu1 %v2738_v18 }
  0x25   : > { %2495 = vmatpush3.bf16.msra.mxu0 %v2726_v10 }
  0x26   : > { %2496 = vmatprep.subr.bf16.mxu0 %v2727_v12 }
  0x27   : > { %2519 = vmatpush3.bf16.msra.mxu1 %v2738_v18 }
  0x28   : > { %2520 = vmatprep.subr.bf16.mxu1 %v2739_v19 }
  0x29   : > { %2497 = vmatpush3.bf16.msra.mxu0 %v2727_v12 }
  0x2a   : > { %2530 = vmatprep.subr.bf16.mxu0 %v2740_v57 }
  0x2b   : > { %2521 = vmatpush3.bf16.msra.mxu1 %v2739_v19 }
  0x2c   : > { %2499 = vmatmul.mubr.bf16.vlgmr.msra.gmra.mxu0 %v2729_v14 }
  0x2d   : > { %2502 = vmatprep.mubr.bf16.mxu0 %v2730_v15  ;;  %2531 = vmatpush3.bf16.msra.mxu0 %v2740_v57 }
  0x2e   : > { %2532 = vmatprep.subr.bf16.mxu0 %v2741_v58 }
  0x31   : > { %2533 = vmatpush3.bf16.msra.mxu0 %v2741_v58 }
  0x32   : > { %2534 = vmatprep.subr.bf16.mxu0 %v2742_v59 }
  0x34   : > { %2503 = vmatmul.mubr.bf16.gmra.mxu0 %v2731_v16 }
  0x35   : > { %2535 = vmatpush3.bf16.msra.mxu0 %v2742_v59 }
  0x36   : > { %2536 = vmatprep.subr.bf16.mxu0 %v2743_v60 }
  0x39   : > { %2537 = vmatpush3.bf16.msra.mxu0 %v2743_v60 }
  0x3a   : > { %2538 = vmatprep.subr.bf16.mxu0 %v2744_v61 }
  0x3d   : > { %2539 = vmatpush3.bf16.msra.mxu0 %v2744_v61 }
  0x3e   : > { %2540 = vmatprep.subr.bf16.mxu0 %v2745_v62 }
  0x41   : > { %2541 = vmatpush3.bf16.msra.mxu0 %v2745_v62 }
  0x42   : > { %2542 = vmatprep.subr.bf16.mxu0 %v2746_v63 }
  0x45   : > { %2543 = vmatpush3.bf16.msra.mxu0 %v2746_v63 }
  0x46   : > { %2544 = vmatprep.subr.bf16.mxu0 %v2747_v0 }
  0x49   : > { %2545 = vmatpush3.bf16.msra.mxu0 %v2747_v0 }
  0xec   : > { %v2500_v20 = vpop.f32.mrf.mxu0 }
  0xed   : > { %v613_v27 = vadd.f32 %v2500_v20, %v2114_v22 }
  0xee   : > { %v604_v21 = vpop.f32.mrf.mxu0 }
  0xef   : > { %v605_v24 = vadd.f32 %v2114_v22, %v604_v21  ;;  %v645_v37 = vadd.f32 %v637_v31, %v613_v27 }
  0xf0   : > { %v2501_v23 = vpop.f32.mrf.mxu0 }
  0xf1   : > { %v616_v25 = vadd.f32 %v2501_v23, %v2114_v22  ;;  %v643_v35 = vadd.f32 %v635_v29, %v605_v24 }
  0xf2   : > { %v607_v28 = vpop.f32.mrf.mxu0 }
  0xf3   : > { %v608_v32 = vadd.f32 %v2114_v22, %v607_v28  ;;  %v646_v33 = vadd.f32 %v638_v26, %v616_v25 }
  0xf4   : > { %v2504_v34 = vpop.f32.mrf.mxu0 }
  0xf5   : > { %v644_v36 = vadd.f32 %v636_v30, %v608_v32  ;;  %v652_v41 = vpack.c.bf16 %v646_v33, %v645_v37  ;;  %v629_v45 = vadd.f32 %v2504_v34, %v2114_v22 }
  0xf6   : > { %v620_v38 = vpop.f32.mrf.mxu0 }
  0xf7   : > { %v651_v39 = vpack.c.bf16 %v644_v36, %v643_v35  ;;  %v621_v42 = vadd.f32 %v2114_v22, %v620_v38  ;;  %v649_v54 = vadd.f32 %v641_v49, %v629_v45 }
  0xf8   : > { %v2505_v40 = vpop.f32.mrf.mxu0 }
  0xf9   : > { %v632_v43 = vadd.f32 %v2505_v40, %v2114_v22  ;;  %2522 = vmatprep.mubr.bf16.mxu1 %v651_v39  ;;  %v647_v52 = vadd.f32 %v639_v46, %v621_v42 }
  0xfa   : > { %v623_v47 = vpop.f32.mrf.mxu0  ;;  %2523 = vmatmul.mubr.bf16.vlgmr.msra.gmra.mxu1 %v652_v41 }
  0xfb   : > { %v624_v50 = vadd.f32 %v2114_v22, %v623_v47  ;;  %v650_v51 = vadd.f32 %v642_v44, %v632_v43 }
  0xfd   : > { %v648_v53 = vadd.f32 %v640_v48, %v624_v50  ;;  %v654_v56 = vpack.c.bf16 %v650_v51, %v649_v54 }
  0xff   : > { %v653_v55 = vpack.c.bf16 %v648_v53, %v647_v52 }
 0x101   : > { %2526 = vmatprep.mubr.bf16.mxu1 %v653_v55 }
 0x102   : > { %2527 = vmatmul.mubr.bf16.gmra.mxu1 %v654_v56 }
 0x1ba   : > { %v2524_v2 = vpop.f32.mrf.mxu1 }
 0x1bb   : > { %v3033_v3 = vadd.f32 %v2524_v2, %v2127_v1 }
 0x1bc   : > { %v760_v4 = vpop.f32.mrf.mxu1 }
 0x1bd   : > { %v793_v5 = vmul.f32 %v3033_v3, %v3033_v3  ;;  %v3037_v6 = vadd.f32 %v2127_v1, %v760_v4 }
 0x1be   : > { %v2525_v7 = vpop.f32.mrf.mxu1 }
 0x1bf   : > { %v801_v8 = vmul.f32 %v793_v5, %v3033_v3  ;;  %v791_v9 = vmul.f32 %v3037_v6, %v3037_v6  ;;  %v3042_v10 = vadd.f32 %v2525_v7, %v2127_v1 }
 0x1c0   : > { %v763_v11 = vpop.f32.mrf.mxu1 }
 0x1c1   : > { %v809_v12 = vmul.f32 0.044715, %v801_v8  ;;  %v799_v13 = vmul.f32 %v791_v9, %v3037_v6  ;;  %v794_v14 = vmul.f32 %v3042_v10, %v3042_v10  ;;  %v3047_v15 = vadd.f32 %v2127_v1, %v763_v11 }
 0x1c2   : > { %v2528_v16 = vpop.f32.mrf.mxu1 }
 0x1c3   : > { %v817_v17 = vadd.f32 %v809_v12, %v3033_v3  ;;  %v807_v18 = vmul.f32 0.044715, %v799_v13  ;;  %v802_v19 = vmul.f32 %v794_v14, %v3042_v10  ;;  %v792_v20 = vmul.f32 %v3047_v15, %v3047_v15 }
 0x1c4   : > { %v3053_v21 = vadd.f32 %v2528_v16, %v2127_v1  ;;  %v776_v22 = vpop.f32.mrf.mxu1 }
 0x1c5   : > { %v825_v23 = vmul.f32 0.7978846, %v817_v17  ;;  %v815_v24 = vadd.f32 %v807_v18, %v3037_v6  ;;  %v810_v25 = vmul.f32 0.044715, %v802_v19  ;;  %v800_v26 = vmul.f32 %v792_v20, %v3047_v15 }
 0x1c6   : > { %v797_v27 = vmul.f32 %v3053_v21, %v3053_v21  ;;  %v3059_v28 = vadd.f32 %v2127_v1, %v776_v22  ;;  %v2529_v29 = vpop.f32.mrf.mxu1 }
 0x1c7   : > { %v823_v30 = vmul.f32 0.7978846, %v815_v24  ;;  %v818_v31 = vadd.f32 %v810_v25, %v3042_v10  ;;  %v808_v32 = vmul.f32 0.044715, %v800_v26  ;;  %2805 = vtanh.f32 %v825_v23 }
 0x1c8   : > { %v805_v33 = vmul.f32 %v797_v27, %v3053_v21  ;;  %v795_v34 = vmul.f32 %v3059_v28, %v3059_v28  ;;  %v788_v35 = vadd.f32 %v2529_v29, %v2127_v1  ;;  %v779_v36 = vpop.f32.mrf.mxu1 }
 0x1c9   : > { %2807 = vtanh.f32 %v823_v30  ;;  %v826_v37 = vmul.f32 0.7978846, %v818_v31  ;;  %v816_v38 = vadd.f32 %v808_v32, %v3047_v15  ;;  %v780_v39 = vadd.f32 %v2127_v1, %v779_v36 }
 0x1ca   : > { %v813_v40 = vmul.f32 0.044715, %v805_v33  ;;  %v803_v41 = vmul.f32 %v795_v34, %v3059_v28  ;;  %v798_v42 = vmul.f32 %v788_v35, %v788_v35  ;;  %v2837_v32 = vmov 0.0  }
 0x1cb   : > { %2809 = vtanh.f32 %v826_v37  ;;  %v824_v43 = vmul.f32 0.7978846, %v816_v38  ;;  %v796_v44 = vmul.f32 %v780_v39, %v780_v39  ;;  %2554 = vmatprep.subr.bf16.mxu1 %v2837_v32  ;;  %2586 = vmatprep.subr.bf16.mxu0 %v2837_v32  ;;  %v2136_v37 = vld [vmem:[%s3378_s7] ss:$0 sm:$0xff] }
 0x1cc   : > { %v821_v45 = vadd.f32 %v813_v40, %v3053_v21  ;;  %v811_v46 = vmul.f32 0.044715, %v803_v41  ;;  %v806_v47 = vmul.f32 %v798_v42, %v788_v35  ;;  %2562 = vmatprep.mubr.msk.bf16.mxu1 %vm2838_vm0, %v2837_v32 }
 0x1cd   : > { %2811 = vtanh.f32 %v824_v43  ;;  %v804_v48 = vmul.f32 %v796_v44, %v780_v39 }
 0x1ce   : > { %v829_v49 = vmul.f32 0.7978846, %v821_v45  ;;  %v819_v50 = vadd.f32 %v811_v46, %v3059_v28  ;;  %v814_v51 = vmul.f32 0.044715, %v806_v47 }
 0x1cf   : > { %v812_v52 = vmul.f32 0.044715, %v804_v48 }
 0x1d0   : > { %2813 = vtanh.f32 %v829_v49  ;;  %v827_v53 = vmul.f32 0.7978846, %v819_v50  ;;  %v822_v54 = vadd.f32 %v814_v51, %v788_v35 }
 0x1d1   : > { %v820_v55 = vadd.f32 %v812_v52, %v780_v39  ;;  %v2748_v52 = vld [vmem:[%s3381_s10] sm:$0xff]  }
 0x1d2   : > { %2815 = vtanh.f32 %v827_v53  ;;  %v830_v56 = vmul.f32 0.7978846, %v822_v54  ;;  %v2749_v53 = vld [vmem:[%s3375_s4 + $0x78] sm:$0xff]   ;;  %v2750_v54 = vld [vmem:[%s3375_s4 + $0x70] sm:$0xff]  }
 0x1d3   : > { %v828_v57 = vmul.f32 0.7978846, %v820_v55  ;;  %v2751_v55 = vld [vmem:[%s3375_s4 + $0x68] sm:$0xff]  }
 0x1d4   : > { %2817 = vtanh.f32 %v830_v56  ;;  %v2806_v58 = vpop.eup %2805  ;;  %v2752_v56 = vld [vmem:[%s3375_s4 + $0x60] sm:$0xff]  }
 0x1d5   : > { %2819 = vtanh.f32 %v828_v57  ;;  %v841_v62 = vadd.f32 1.0, %v2806_v58  ;;  %v2753_v57 = vld [vmem:[%s3375_s4 + $0x58] sm:$0xff]   ;;  %v2754_v58 = vld [vmem:[%s3375_s4 + $0x50] sm:$0xff]  }
 0x1d6   : > { %v2808_v59 = vpop.eup %2807 }
 0x1d7   : > { %v839_v60 = vadd.f32 1.0, %v2808_v59  ;;  %v849_v5 = vmul.f32 0.5, %v841_v62  ;;  %v2755_v59 = vld [vmem:[%s3375_s4 + $0x48] sm:$0xff]  }
 0x1d8   : > { %v2810_v61 = vpop.eup %2809 }
 0x1d9   : > { %v842_v63 = vadd.f32 1.0, %v2810_v61  ;;  %v847_v4 = vmul.f32 0.5, %v839_v60  ;;  %v857_v14 = vmul.f32 %v849_v5, %v3033_v3  ;;  %v2756_v60 = vld [vmem:[%s3375_s4 + $0x40] sm:$0xff]   ;;  %v2759_v5 = vld [vmem:[%s3377_s6 + $0x68] sm:$0xff]  }
 0x1da   : > { %v2812_v0 = vpop.eup %2811 }
 0x1db   : > { %v850_v1 = vmul.f32 0.5, %v842_v63  ;;  %v840_v2 = vadd.f32 1.0, %v2812_v0  ;;  %v855_v12 = vmul.f32 %v847_v4, %v3037_v6  ;;  %v2758_v4 = vld [vmem:[%s3377_s6 + $0x70] sm:$0xff]  }
 0x1dd   : > { %v2814_v7 = vpop.eup %2813  ;;  %v848_v8 = vmul.f32 0.5, %v840_v2  ;;  %v858_v9 = vmul.f32 %v850_v1, %v3042_v10  ;;  %v2757_v2 = vld [vmem:[%s3377_s6 + $0x78] sm:$0xff]  }
 0x1de   : > { %v845_v17 = vadd.f32 1.0, %v2814_v7  ;;  %v2760_v7 = vld [vmem:[%s3377_s6 + $0x60] sm:$0xff]  }
 0x1df   : > { %v2816_v11 = vpop.eup %2815  ;;  %v856_v13 = vmul.f32 %v848_v8, %v3047_v15  ;;  %v864_v22 = vpack.c.bf16 %v858_v9, %v857_v14  ;;  %v2761_v8 = vld [vmem:[%s3377_s6 + $0x58] sm:$0xff]   ;;  %v2762_v9 = vld [vmem:[%s3377_s6 + $0x50] sm:$0xff]  }
 0x1e0   : > { %v843_v16 = vadd.f32 1.0, %v2816_v11  ;;  %v853_v26 = vmul.f32 0.5, %v845_v17  ;;  %v2763_v11 = vld [vmem:[%s3377_s6 + $0x48] sm:$0xff]   ;;  %v2766_v14 = vld [vmem:[%s3375_s4 + $0xb0] sm:$0xff]   ;;  %v2768_v17 = vld [vmem:[%s3375_s4 + $0xa0] sm:$0xff]  }
 0x1e1   : > { %v2818_v18 = vpop.eup %2817  ;;  %v863_v19 = vpack.c.bf16 %v856_v13, %v855_v12  ;;  %v2764_v12 = vld [vmem:[%s3377_s6 + $0x40] sm:$0xff]   ;;  %v2765_v13 = vld [vmem:[%s3375_s4 + $0xb8] sm:$0xff]  }
 0x1e2   : > { %v2820_v20 = vpop.eup %2819  ;;  %v846_v23 = vadd.f32 1.0, %v2818_v18  ;;  %v851_v25 = vmul.f32 0.5, %v843_v16  ;;  %v861_v3 = vmul.f32 %v853_v26, %v3053_v21  ;;  %v2767_v16 = vld [vmem:[%s3375_s4 + $0xa8] sm:$0xff]   ;;  %v2769_v18 = vld [vmem:[%s3375_s4 + $0x98] sm:$0xff]  }
 0x1e3   : > { %2546 = vmatprep.mubr.bf16.mxu0 %v863_v19  ;;  %v844_v24 = vadd.f32 1.0, %v2820_v20  ;;  %v2770_v19 = vld [vmem:[%s3375_s4 + $0x90] sm:$0xff]   ;;  %v2164_v20 = vld [vmem:[%s3376_s5 + $0x1] ss:$0 sm:$0xff] }
 0x1e4   : > { %2547 = vmatmul.mubr.bf16.vlgmr.msra.gmra.mxu0 %v864_v22  ;;  %v854_v10 = vmul.f32 0.5, %v846_v23  ;;  %v859_v6 = vmul.f32 %v851_v25, %v3059_v28 }
 0x1e5   : > { %v852_v27 = vmul.f32 0.5, %v844_v24  ;;  %2587 = vmatpush3.bf16.msra.mxu0 %v2757_v2  ;;  %v2786_v2 = vld [vmem:[%s3377_s6 + $0x90] sm:$0xff]  }
 0x1e6   : > { %v862_v29 = vmul.f32 %v854_v10, %v788_v35  ;;  %2588 = vmatprep.subr.bf16.mxu0 %v2837_v32 }
 0x1e7   : > { %v860_v15 = vmul.f32 %v852_v27, %v780_v39 }
 0x1e8   : > { %v866_v31 = vpack.c.bf16 %v862_v29, %v861_v3 }
 0x1e9   : > { %v865_v30 = vpack.c.bf16 %v860_v15, %v859_v6  ;;  %2589 = vmatpush3.bf16.msra.mxu0 %v2758_v4  ;;  %v2787_v4 = vld [vmem:[%s3377_s6 + $0x88] sm:$0xff]  }
 0x1ea   : > { %2590 = vmatprep.subr.bf16.mxu0 %v2837_v32 }
 0x1eb   : > { %2550 = vmatprep.mubr.bf16.mxu0 %v865_v30 }
 0x1ec   : > { %2551 = vmatmul.mubr.bf16.gmra.mxu0 %v866_v31 }
 0x1ed   : > { %2602 = vmatprep.mubr.msk.bf16.mxu0 %vm2838_vm0, %v2837_v32  ;;  %2591 = vmatpush3.bf16.msra.mxu0 %v2759_v5  ;;  %v2788_v5 = vld [vmem:[%s3377_s6 + $0x80] sm:$0xff]  }
 0x1ee   : > { %2592 = vmatprep.subr.bf16.mxu0 %v2837_v32 }
 0x1f1   : > { %2593 = vmatpush3.bf16.msra.mxu0 %v2760_v7  ;;  %v2797_v7 = vld [vmem:[%s3379_s8 + $0xb8] sm:$0xff]  }
 0x1f2   : > { %2594 = vmatprep.subr.bf16.mxu0 %v2837_v32 }
 0x1f5   : > { %2595 = vmatpush3.bf16.msra.mxu0 %v2761_v8  ;;  %v2798_v8 = vld [vmem:[%s3379_s8 + $0xb0] sm:$0xff]  }
 0x1f6   : > { %2596 = vmatprep.subr.bf16.mxu0 %v2837_v32 }
 0x1f9   : > { %2597 = vmatpush3.bf16.msra.mxu0 %v2762_v9  ;;  %v2799_v9 = vld [vmem:[%s3379_s8 + $0xa8] sm:$0xff]  }
 0x1fa   : > { %2598 = vmatprep.subr.bf16.mxu0 %v2837_v32 }
 0x1fd   : > { %2599 = vmatpush3.bf16.msra.mxu0 %v2763_v11  ;;  %v2800_v11 = vld [vmem:[%s3379_s8 + $0xa0] sm:$0xff]  }
 0x1fe   : > { %2600 = vmatprep.subr.bf16.mxu0 %v2837_v32 }
 0x201   : > { %2601 = vmatpush3.bf16.msra.mxu0 %v2764_v12  ;;  %v2801_v12 = vld [vmem:[%s3379_s8 + $0x98] sm:$0xff]  }
 0x202   : > { %2626 = vmatprep.subr.bf16.mxu0 %v2837_v32 }
 0x2a4   : > { %v2548_v28 = vpop.f32.mrf.mxu0 }
 0x2a5   : > { %v981_v47 = vadd.f32 %v2548_v28, %v2136_v37 }
 0x2a6   : > { %v972_v33 = vpop.f32.mrf.mxu0 }
 0x2a7   : > { %v973_v50 = vadd.f32 %v2136_v37, %v972_v33 }
 0x2a8   : > { %v2549_v34 = vpop.f32.mrf.mxu0 }
 0x2a9   : > { %v984_v45 = vadd.f32 %v2549_v34, %v2136_v37 }
 0x2aa   : > { %v975_v21 = vpop.f32.mrf.mxu0 }
 0x2ab   : > { %v3092_v48 = vpack.c.bf16 %v984_v45, %v981_v47  ;;  %v976_v49 = vadd.f32 %v2136_v37, %v975_v21  ;;  %v2772_v45 = vld [vmem:[%s3375_s4 + $0x80] sm:$0xff]   ;;  %v2773_v47 = vld [vmem:[%s3379_s8 + $0x38] sm:$0xff]  }
 0x2ac   : > { %v2552_v35 = vpop.f32.mrf.mxu0 }
 0x2ad   : > { %v997_v39 = vadd.f32 %v2552_v35, %v2136_v37  ;;  %v3096_v51 = vpack.c.bf16 %v976_v49, %v973_v50  ;;  %v2190_v50 = vld [vmem:[%s3378_s7 + $0x1] ss:$0 sm:$0xff] }
 0x2ae   : > { %v988_v36 = vpop.f32.mrf.mxu0 }
 0x2af   : > { %v989_v44 = vadd.f32 %v2136_v37, %v988_v36 }
 0x2b0   : > { %v2553_v38 = vpop.f32.mrf.mxu0 }
 0x2b1   : > { %v1000_v40 = vadd.f32 %v2553_v38, %v2136_v37 }
 0x2b2   : > { %v991_v41 = vpop.f32.mrf.mxu0 }
 0x2b3   : > { %v3084_v42 = vpack.c.bf16 %v1000_v40, %v997_v39  ;;  %v992_v43 = vadd.f32 %v2136_v37, %v991_v41 }
 0x2b5   : > { %2555 = vmatpush3.bf16.msra.mxu1 %v3084_v42  ;;  %v3088_v46 = vpack.c.bf16 %v992_v43, %v989_v44  ;;  %v2771_v44 = vld [vmem:[%s3375_s4 + $0x88] sm:$0xff]  }
 0x2b6   : > { %2556 = vmatprep.subr.bf16.mxu1 %v2837_v32 }
 0x2b9   : > { %2557 = vmatpush3.bf16.msra.mxu1 %v3088_v46 }
 0x2ba   : > { %2558 = vmatprep.subr.bf16.mxu1 %v2837_v32 }
 0x2bd   : > { %2559 = vmatpush3.bf16.msra.mxu1 %v3092_v48 }
 0x2be   : > { %2560 = vmatprep.subr.bf16.mxu1 %v2837_v32 }
 0x2c1   : > { %2561 = vmatpush3.bf16.msra.mxu1 %v3096_v51 }
 0x2c2   : > { %2566 = vmatprep.subr.bf16.mxu1 %v2837_v32 }
 0x2c4   : > { %2563 = vmatmul.mubr.msk.bf16.vlgmr.msra.gmra.mxu1 %vm1014_vm1, %v2748_v52 }
 0x2c5   : > { %2567 = vmatpush3.bf16.msra.mxu1 %v2749_v53  ;;  %2582 = vmatprep.mubr.msk.bf16.mxu1 %vm2838_vm0, %v2837_v32 }
 0x2c6   : > { %2568 = vmatprep.subr.bf16.mxu1 %v2837_v32 }
 0x2c9   : > { %2569 = vmatpush3.bf16.msra.mxu1 %v2750_v54 }
 0x2ca   : > { %2570 = vmatprep.subr.bf16.mxu1 %v2837_v32 }
 0x2cd   : > { %2571 = vmatpush3.bf16.msra.mxu1 %v2751_v55 }
 0x2ce   : > { %2572 = vmatprep.subr.bf16.mxu1 %v2837_v32 }
 0x2d1   : > { %2573 = vmatpush3.bf16.msra.mxu1 %v2752_v56 }
 0x2d2   : > { %2574 = vmatprep.subr.bf16.mxu1 %v2837_v32 }
 0x2d5   : > { %2575 = vmatpush3.bf16.msra.mxu1 %v2753_v57 }
 0x2d6   : > { %2576 = vmatprep.subr.bf16.mxu1 %v2837_v32 }
 0x2d9   : > { %2577 = vmatpush3.bf16.msra.mxu1 %v2754_v58  ;;  %v2774_v58 = vld [vmem:[%s3379_s8 + $0x30] sm:$0xff]  }
 0x2da   : > { %2578 = vmatprep.subr.bf16.mxu1 %v2837_v32 }
 0x2dd   : > { %2579 = vmatpush3.bf16.msra.mxu1 %v2755_v59  ;;  %v2775_v59 = vld [vmem:[%s3379_s8 + $0x28] sm:$0xff]  }
 0x2de   : > { %2580 = vmatprep.subr.bf16.mxu1 %v2837_v32 }
 0x2e1   : > { %2581 = vmatpush3.bf16.msra.mxu1 %v2756_v60  ;;  %v2776_v60 = vld [vmem:[%s3379_s8 + $0x20] sm:$0xff]  }
 0x2e2   : > { %2606 = vmatprep.subr.bf16.mxu1 %v2837_v32 }
 0x384   : > { %v1052_v61 = vpop.f32.mrf.mxu1 }
 0x386   : > { %v2564_v62 = vpop.f32.mrf.mxu1 }
 0x387   : > { %v2779_v62 = vld [vmem:[%s3379_s8 + $0x8] sm:$0xff]  }
 0x388   : > { %v1055_v63 = vpop.f32.mrf.mxu1 }
 0x389   : > { %v1059_v0 = vpack.c.bf16 %v1055_v63, %v1052_v61  ;;  %v2777_v61 = vld [vmem:[%s3379_s8 + $0x18] sm:$0xff]   ;;  %v2780_v63 = vld [vmem:[%s3379_s8] sm:$0xff]  }
 0x38a   : > { %v2565_v1 = vpop.f32.mrf.mxu1 }
 0x38b   : > { %2583 = vmatmul.mubr.bf16.vlgmr.msra.gmra.mxu1 %v1059_v0  ;;  %v2781_v0 = vld [vmem:[%s3377_s6 + $0xb8] sm:$0xff]   ;;  %v2782_v1 = vld [vmem:[%s3377_s6 + $0xb0] sm:$0xff]  }
 0x38c   : > { %2622 = vmatprep.mubr.msk.bf16.mxu1 %vm2838_vm0, %v2837_v32  ;;  %2607 = vmatpush3.bf16.msra.mxu1 %v2765_v13  ;;  %v2802_v13 = vld [vmem:[%s3379_s8 + $0x90] sm:$0xff]  }
 0x38d   : > { %2608 = vmatprep.subr.bf16.mxu1 %v2837_v32 }
 0x390   : > { %2609 = vmatpush3.bf16.msra.mxu1 %v2766_v14  ;;  %v2216_v14 = vld [vmem:[%s3376_s5 + $0x2] ss:$0 sm:$0xff] }
 0x391   : > { %2610 = vmatprep.subr.bf16.mxu1 %v2837_v32 }
 0x394   : > { %2611 = vmatpush3.bf16.msra.mxu1 %v2767_v16 }
 0x395   : > { %2612 = vmatprep.subr.bf16.mxu1 %v2837_v32 }
 0x398   : > { %2613 = vmatpush3.bf16.msra.mxu1 %v2768_v17 }
 0x399   : > { %2614 = vmatprep.subr.bf16.mxu1 %v2837_v32 }
 0x39c   : > { %2615 = vmatpush3.bf16.msra.mxu1 %v2769_v18 }
 0x39d   : > { %2616 = vmatprep.subr.bf16.mxu1 %v2837_v32 }
 0x3a0   : > { %2617 = vmatpush3.bf16.msra.mxu1 %v2770_v19 }
 0x3a1   : > { %2618 = vmatprep.subr.bf16.mxu1 %v2837_v32 }
 0x3a4   : > { %2619 = vmatpush3.bf16.msra.mxu1 %v2771_v44 }
 0x3a5   : > { %2620 = vmatprep.subr.bf16.mxu1 %v2837_v32 }
 0x3a8   : > { %2621 = vmatpush3.bf16.msra.mxu1 %v2772_v45 }
 0x3a9   : > { %2646 = vmatprep.subr.bf16.mxu1 %v2773_v47 }
 0x44b   : > { %v1167_v22 = vpop.f32.mrf.mxu1 }
 0x44c   : > { %v1168_v23 = vadd.f32 %v2164_v20, %v1167_v22 }
 0x44d   : > { %v2584_v24 = vpop.f32.mrf.mxu1 }
 0x44e   : > { %v1174_v25 = vmul.f32 %v1168_v23, %v1168_v23 }
 0x44f   : > { %v1170_v26 = vpop.f32.mrf.mxu1 }
 0x450   : > { %v1176_v10 = vmul.f32 %v1174_v25, %v1168_v23  ;;  %v1171_v27 = vadd.f32 %v2164_v20, %v1170_v26 }
 0x451   : > { %v2585_v29 = vpop.f32.mrf.mxu1 }
 0x452   : > { %v1178_v6 = vmul.f32 0.044715, %v1176_v10  ;;  %v1175_v15 = vmul.f32 %v1171_v27, %v1171_v27 }
 0x454   : > { %v1180_v3 = vadd.f32 %v1178_v6, %v1168_v23  ;;  %v1177_v30 = vmul.f32 %v1175_v15, %v1171_v27 }
 0x456   : > { %v1182_v31 = vmul.f32 0.7978846, %v1180_v3  ;;  %v1179_v28 = vmul.f32 0.044715, %v1177_v30 }
 0x458   : > { %2821 = vtanh.f32 %v1182_v31  ;;  %v1181_v33 = vadd.f32 %v1179_v28, %v1171_v27 }
 0x45a   : > { %v1183_v34 = vmul.f32 0.7978846, %v1181_v33 }
 0x45c   : > { %2823 = vtanh.f32 %v1183_v34 }
 0x465   : > { %v2822_v21 = vpop.eup %2821 }
 0x466   : > { %v1186_v35 = vadd.f32 1.0, %v2822_v21 }
 0x468   : > { %v1188_v37 = vmul.f32 0.5, %v1186_v35 }
 0x469   : > { %v2824_v36 = vpop.eup %2823 }
 0x46a   : > { %v1187_v38 = vadd.f32 1.0, %v2824_v36  ;;  %v1190_v40 = vmul.f32 %v1188_v37, %v1168_v23  ;;  %v2251_v36 = vld [vmem:[%s3380_s9] ss:$0 sm:$0xff] }
 0x46c   : > { %v1189_v39 = vmul.f32 0.5, %v1187_v38 }
 0x46e   : > { %v1191_v41 = vmul.f32 %v1189_v39, %v1171_v27 }
 0x470   : > { %v1192_v43 = vpack.c.bf16 %v1191_v41, %v1190_v40  ;;  %v2789_v41 = vld [vmem:[%s3379_s8 + $0x78] sm:$0xff]  }
 0x472   : > { %2603 = vmatmul.mubr.bf16.vlgmr.msra.gmra.mxu0 %v1192_v43 }
 0x473   : > { %2642 = vmatprep.mubr.msk.bf16.mxu0 %vm2838_vm0, %v2837_v32  ;;  %2627 = vmatpush3.bf16.msra.mxu0 %v2781_v0 }
 0x474   : > { %2628 = vmatprep.subr.bf16.mxu0 %v2837_v32 }
 0x477   : > { %2629 = vmatpush3.bf16.msra.mxu0 %v2782_v1  ;;  %v2792_v1 = vld [vmem:[%s3379_s8 + $0x60] sm:$0xff]  }
 0x478   : > { %2630 = vmatprep.subr.bf16.mxu0 %v2837_v32 }
 0x532   : > { %v1300_v49 = vpop.f32.mrf.mxu0 }
 0x533   : > { %v1301_v54 = vadd.f32 %v2190_v50, %v1300_v49 }
 0x534   : > { %v2604_v52 = vpop.f32.mrf.mxu0 }
 0x536   : > { %v1303_v53 = vpop.f32.mrf.mxu0 }
 0x537   : > { %v1304_v55 = vadd.f32 %v2190_v50, %v1303_v53 }
 0x538   : > { %v2605_v56 = vpop.f32.mrf.mxu0 }
 0x539   : > { %v3213_v57 = vpack.c.bf16 %v1304_v55, %v1301_v54  ;;  %v2790_v54 = vld [vmem:[%s3379_s8 + $0x70] sm:$0xff]  }
 0x53b   : > { %2623 = vmatmul.mubr.bf16.vlgmr.msra.gmra.mxu1 %v3213_v57 }
 0x53c   : > { %2647 = vmatpush3.bf16.msra.mxu1 %v2773_v47  ;;  %2662 = vmatprep.mubr.bf16.mxu1 %v3096_v51  ;;  %v2778_v51 = vld [vmem:[%s3379_s8 + $0x10] sm:$0xff]  }
 0x53d   : > { %2648 = vmatprep.subr.bf16.mxu1 %v2774_v58 }
 0x540   : > { %2649 = vmatpush3.bf16.msra.mxu1 %v2774_v58 }
 0x541   : > { %2650 = vmatprep.subr.bf16.mxu1 %v2775_v59 }
 0x544   : > { %2651 = vmatpush3.bf16.msra.mxu1 %v2775_v59  ;;  %v2791_v59 = vld [vmem:[%s3379_s8 + $0x68] sm:$0xff]  }
 0x545   : > { %2652 = vmatprep.subr.bf16.mxu1 %v2776_v60 }
 0x548   : > { %2653 = vmatpush3.bf16.msra.mxu1 %v2776_v60 }
 0x549   : > { %2654 = vmatprep.subr.bf16.mxu1 %v2777_v61 }
 0x54c   : > { %2655 = vmatpush3.bf16.msra.mxu1 %v2777_v61 }
 0x54d   : > { %2656 = vmatprep.subr.bf16.mxu1 %v2778_v51 }
 0x550   : > { %2657 = vmatpush3.bf16.msra.mxu1 %v2778_v51 }
 0x551   : > { %2658 = vmatprep.subr.bf16.mxu1 %v2779_v62 }
 0x554   : > { %2659 = vmatpush3.bf16.msra.mxu1 %v2779_v62 }
 0x555   : > { %2660 = vmatprep.subr.bf16.mxu1 %v2780_v63 }
 0x558   : > { %2661 = vmatpush3.bf16.msra.mxu1 %v2780_v63 }
 0x559   : > { %2690 = vmatprep.subr.bf16.mxu1 %v2837_v32 }
 0x55b   : > { %2663 = vmatmul.mubr.bf16.vlgmr.msra.gmra.mxu1 %v3092_v48  ;;  %v2785_v48 = vld [vmem:[%s3377_s6 + $0x98] sm:$0xff]  }
 0x55c   : > { %2666 = vmatprep.mubr.bf16.mxu1 %v3088_v46  ;;  %v2784_v46 = vld [vmem:[%s3377_s6 + $0xa0] sm:$0xff]   ;;  %2691 = vmatpush3.bf16.msra.mxu1 %v2797_v7 }
 0x55d   : > { %2692 = vmatprep.subr.bf16.mxu1 %v2837_v32  ;;  %v2804_v7 = vld [vmem:[%s3379_s8 + $0x80] sm:$0xff]  }
 0x560   : > { %2693 = vmatpush3.bf16.msra.mxu1 %v2798_v8 }
 0x561   : > { %2694 = vmatprep.subr.bf16.mxu1 %v2837_v32 }
 0x563   : > { %2667 = vmatmul.mubr.bf16.gmra.mxu1 %v3084_v42  ;;  %v2783_v42 = vld [vmem:[%s3377_s6 + $0xa8] sm:$0xff]  }
 0x564   : > { %2706 = vmatprep.mubr.msk.bf16.mxu1 %vm2838_vm0, %v2837_v32  ;;  %2631 = vmatpush3.bf16.msra.mxu0 %v2783_v42 }
 0x565   : > { %2632 = vmatprep.subr.bf16.mxu0 %v2837_v32  ;;  %2695 = vmatpush3.bf16.msra.mxu1 %v2799_v9  ;;  %v2242_v9 = vld [vmem:[%s3378_s7 + $0x2] ss:$0 sm:$0xff] }
 0x566   : > { %2696 = vmatprep.subr.bf16.mxu1 %v2837_v32 }
 0x568   : > { %2633 = vmatpush3.bf16.msra.mxu0 %v2784_v46  ;;  %v2793_v46 = vld [vmem:[%s3379_s8 + $0x58] sm:$0xff]  }
 0x569   : > { %2634 = vmatprep.subr.bf16.mxu0 %v2837_v32  ;;  %2697 = vmatpush3.bf16.msra.mxu1 %v2800_v11 }
 0x56a   : > { %2698 = vmatprep.subr.bf16.mxu1 %v2837_v32 }
 0x56c   : > { %2635 = vmatpush3.bf16.msra.mxu0 %v2785_v48  ;;  %v2794_v48 = vld [vmem:[%s3379_s8 + $0x50] sm:$0xff]  }
 0x56d   : > { %2636 = vmatprep.subr.bf16.mxu0 %v2837_v32  ;;  %2699 = vmatpush3.bf16.msra.mxu1 %v2801_v12 }
 0x56e   : > { %2700 = vmatprep.subr.bf16.mxu1 %v2837_v32 }
 0x570   : > { %2637 = vmatpush3.bf16.msra.mxu0 %v2786_v2  ;;  %v2795_v2 = vld [vmem:[%s3379_s8 + $0x48] sm:$0xff]  }
 0x571   : > { %2638 = vmatprep.subr.bf16.mxu0 %v2837_v32  ;;  %2701 = vmatpush3.bf16.msra.mxu1 %v2802_v13 }
 0x572   : > { %2702 = vmatprep.subr.bf16.mxu1 %v2837_v32 }
 0x574   : > { %2639 = vmatpush3.bf16.msra.mxu0 %v2787_v4  ;;  %v2796_v4 = vld [vmem:[%s3379_s8 + $0x40] sm:$0xff]  }
 0x575   : > { %2640 = vmatprep.subr.bf16.mxu0 %v2837_v32 }
 0x578   : > { %2641 = vmatpush3.bf16.msra.mxu0 %v2788_v5  ;;  %v2803_v5 = vld [vmem:[%s3379_s8 + $0x88] sm:$0xff]  }
 0x579   : > { %2670 = vmatprep.subr.bf16.mxu0 %v2837_v32  ;;  %2703 = vmatpush3.bf16.msra.mxu1 %v2803_v5 }
 0x57a   : > { %2704 = vmatprep.subr.bf16.mxu1 %v2837_v32 }
 0x57d   : > { %2705 = vmatpush3.bf16.msra.mxu1 %v2804_v7 }
 0x5fb   : > { %v1415_v16 = vpop.f32.mrf.mxu1 }
 0x5fc   : > { %v1416_v17 = vadd.f32 %v2216_v14, %v1415_v16 }
 0x5fd   : > { %v2624_v18 = vpop.f32.mrf.mxu1 }
 0x5fe   : > { %v1422_v19 = vmul.f32 %v1416_v17, %v1416_v17 }
 0x5ff   : > { %v1418_v20 = vpop.f32.mrf.mxu1 }
 0x600   : > { %v1424_v22 = vmul.f32 %v1422_v19, %v1416_v17  ;;  %v1419_v23 = vadd.f32 %v2216_v14, %v1418_v20 }
 0x601   : > { %v2625_v24 = vpop.f32.mrf.mxu1 }
 0x602   : > { %v1426_v25 = vmul.f32 0.044715, %v1424_v22  ;;  %v1423_v26 = vmul.f32 %v1419_v23, %v1419_v23 }
 0x604   : > { %v1428_v10 = vadd.f32 %v1426_v25, %v1416_v17  ;;  %v1425_v27 = vmul.f32 %v1423_v26, %v1419_v23  ;;  %v2313_v26 = vld [vmem:[%s3380_s9 + $0x2] ss:$0 sm:$0xff] }
 0x606   : > { %v1430_v29 = vmul.f32 0.7978846, %v1428_v10  ;;  %v1427_v6 = vmul.f32 0.044715, %v1425_v27 }
 0x608   : > { %2825 = vtanh.f32 %v1430_v29  ;;  %v1429_v15 = vadd.f32 %v1427_v6, %v1419_v23 }
 0x60a   : > { %v1431_v3 = vmul.f32 0.7978846, %v1429_v15 }
 0x60c   : > { %2827 = vtanh.f32 %v1431_v3 }
 0x615   : > { %v2826_v30 = vpop.eup %2825 }
 0x616   : > { %v1434_v31 = vadd.f32 1.0, %v2826_v30 }
 0x618   : > { %v1436_v33 = vmul.f32 0.5, %v1434_v31 }
 0x619   : > { %v2828_v28 = vpop.eup %2827 }
 0x61a   : > { %v1435_v34 = vadd.f32 1.0, %v2828_v28  ;;  %v1438_v38 = vmul.f32 %v1436_v33, %v1416_v17 }
 0x61b   : > { %v2664_v21 = vpop.f32.mrf.mxu1 }
 0x61c   : > { %v1437_v35 = vmul.f32 0.5, %v1435_v34  ;;  %v1669_v43 = vadd.f32 %v2664_v21, %v2251_v36 }
 0x61d   : > { %v1660_v37 = vpop.f32.mrf.mxu1 }
 0x61e   : > { %v1439_v39 = vmul.f32 %v1437_v35, %v1419_v23  ;;  %v1661_v49 = vadd.f32 %v2251_v36, %v1660_v37 }
 0x61f   : > { %v2665_v40 = vpop.f32.mrf.mxu1 }
 0x620   : > { %v1672_v44 = vadd.f32 %v2665_v40, %v2251_v36  ;;  %v1440_v45 = vpack.c.bf16 %v1439_v39, %v1438_v38 }
 0x621   : > { %v1663_v47 = vpop.f32.mrf.mxu1 }
 0x622   : > { %v2350_v50 = vpack.c.bf16 %v1672_v44, %v1669_v43  ;;  %v1664_v52 = vadd.f32 %v2251_v36, %v1663_v47  ;;  %2643 = vmatmul.mubr.bf16.vlgmr.msra.gmra.mxu0 %v1440_v45 }
 0x623   : > { %v2668_v53 = vpop.f32.mrf.mxu1  ;;  %2671 = vmatpush3.bf16.msra.mxu0 %v2789_v41  ;;  %2686 = vmatprep.mubr.msk.bf16.mxu0 %vm2838_vm0, %v2837_v32 }
 0x624   : > { %2372 = vst [vmem:[%s455_s23 + $0x8] sm:$0xff] %v2350_v50   ;;  %v2345_v55 = vpack.c.bf16 %v1664_v52, %v1661_v49  ;;  %2672 = vmatprep.subr.bf16.mxu0 %v2837_v32  ;;  %v1685_v60 = vadd.f32 %v2668_v53, %v2251_v36 }
 0x625   : > { %v1676_v56 = vpop.f32.mrf.mxu1 }
 0x626   : > { %2346 = vst [vmem:[%s455_s23] sm:$0xff] %v2345_v55   ;;  %v1677_v62 = vadd.f32 %v2251_v36, %v1676_v56 }
 0x627   : > { %v2669_v58 = vpop.f32.mrf.mxu1  ;;  %2673 = vmatpush3.bf16.msra.mxu0 %v2790_v54 }
 0x628   : > { %v1688_v61 = vadd.f32 %v2669_v58, %v2251_v36  ;;  %2674 = vmatprep.subr.bf16.mxu0 %v2837_v32 }
 0x629   : > { %v1679_v51 = vpop.f32.mrf.mxu1 }
 0x62a   : > { %v2360_v63 = vpack.c.bf16 %v1688_v61, %v1685_v60  ;;  %v1680_v0 = vadd.f32 %v2251_v36, %v1679_v51 }
 0x62b   : > { %2675 = vmatpush3.bf16.msra.mxu0 %v2791_v59 }
 0x62c   : > { %2374 = vst [vmem:[%s455_s23 + $0x18] sm:$0xff] %v2360_v63   ;;  %v2355_v42 = vpack.c.bf16 %v1680_v0, %v1677_v62  ;;  %2676 = vmatprep.subr.bf16.mxu0 %v2837_v32 }
 0x62e   : > { %2373 = vst [vmem:[%s455_s23 + $0x10] sm:$0xff] %v2355_v42   ;;  %s465_s23 = scalar_lea.vmem %s3384_s13, %s2328_s15 }
 0x62f   : > { %2677 = vmatpush3.bf16.msra.mxu0 %v2792_v1 }
 0x630   : > { %2678 = vmatprep.subr.bf16.mxu0 %v2837_v32 }
 0x633   : > { %2679 = vmatpush3.bf16.msra.mxu0 %v2793_v46 }
 0x634   : > { %2680 = vmatprep.subr.bf16.mxu0 %v2837_v32 }
 0x637   : > { %2681 = vmatpush3.bf16.msra.mxu0 %v2794_v48 }
 0x638   : > { %2682 = vmatprep.subr.bf16.mxu0 %v2837_v32 }
 0x63b   : > { %2683 = vmatpush3.bf16.msra.mxu0 %v2795_v2 }
 0x63c   : > { %2684 = vmatprep.subr.bf16.mxu0 %v2837_v32  ;;  %v2285_v32 = vld [vmem:[%s3380_s9 + $0x1] ss:$0 sm:$0xff] }
 0x63f   : > { %2685 = vmatpush3.bf16.msra.mxu0 %v2796_v4 }
 0x642   : > { %2687 = vmatmul.mubr.bf16.vlgmr.msra.gmra.mxu0 %v3213_v57 }
 0x6e2   : > { %v1548_v8 = vpop.f32.mrf.mxu0 }
 0x6e3   : > { %v1549_v12 = vadd.f32 %v2242_v9, %v1548_v8 }
 0x6e4   : > { %v2644_v11 = vpop.f32.mrf.mxu0 }
 0x6e6   : > { %v1551_v57 = vpop.f32.mrf.mxu0 }
 0x6e7   : > { %v1552_v13 = vadd.f32 %v2242_v9, %v1551_v57 }
 0x6e8   : > { %v2645_v14 = vpop.f32.mrf.mxu0 }
 0x6e9   : > { %v1855_v16 = vpack.c.bf16 %v1552_v13, %v1549_v12 }
 0x6eb   : > { %2707 = vmatmul.mubr.bf16.vlgmr.msra.gmra.mxu1 %v1855_v16 }
 0x702   : > { %v1838_v17 = vpop.f32.mrf.mxu0 }
 0x703   : > { %v1839_v20 = vadd.f32 %v2285_v32, %v1838_v17 }
 0x704   : > { %v2688_v18 = vpop.f32.mrf.mxu0 }
 0x706   : > { %v1841_v19 = vpop.f32.mrf.mxu0 }
 0x707   : > { %v1842_v22 = vadd.f32 %v2285_v32, %v1841_v19 }
 0x708   : > { %v2689_v23 = vpop.f32.mrf.mxu0 }
 0x709   : > { %v2365_v24 = vpack.c.bf16 %v1842_v22, %v1839_v20 }
 0x70b   : > { %2366 = vst [vmem:[%s460_s19] sm:$0xff] %v2365_v24  }
 0x7ab   : > { %v1963_v25 = vpop.f32.mrf.mxu1 }
 0x7ac   : > { %v1964_v29 = vadd.f32 %v2313_v26, %v1963_v25 }
 0x7ad   : > { %v2708_v10 = vpop.f32.mrf.mxu1 }
 0x7af   : > { %v1966_v27 = vpop.f32.mrf.mxu1 }
 0x7b0   : > { %v1967_v6 = vadd.f32 %v2313_v26, %v1966_v27 }
 0x7b1   : > { %v2709_v15 = vpop.f32.mrf.mxu1 }
 0x7b2   : > { %v2370_v3 = vpack.c.bf16 %v1967_v6, %v1964_v29 }
 0x7b4   : > { %2371 = vst [vmem:[%s465_s23] sm:$0xff] %v2370_v3  }
 0x7b5 PF: > { %s24_s25 = sadd.s32 1, %s2835_s25  }
 0x7b6   : > { %p21_p4 = scmp.ge.s32.totalorder %s24_s25, 4  }
 0x7b8   :  { %23 = sbr.rel (!%p21_p4) target bundleno = 1 (0x1), region = 130 }

// kernel: promptable_sam2_forward.3
= control target key start
LH: loop header
LB: loop body
LE: loop exit
PB: predicated region body
PF: predicated region fallthrough
CT: control target
= control target key end

     0   :  { %s1744_s25 = smov 0   ;;  %s2009_s0 = inlined_call_operand.vmem [shape: f32[2,1,128], index: 0, kind: input, shape index: {}]   ;;  %s2010_s1 = inlined_call_operand.vmem [shape: bf16[2,16,128], index: 1, kind: input, shape index: {}]   ;;  %s2011_s2 = inlined_call_operand.vmem [shape: bf16[2,16,128], index: 2, kind: input, shape index: {}]   ;;  %s2012_s3 = inlined_call_operand.vmem [shape: bf16[2,64,128], index: 3, kind: input, shape index: {}]   ;;  %s2013_s4 = inlined_call_operand.vmem [shape: bf16[64,16], index: 4, kind: input, shape index: {}]   ;;  %s2014_s5 = inlined_call_operand.vmem [shape: bf16[128,128], index: 5, kind: input, shape index: {}]   ;;  %s2015_s6 = inlined_call_operand.vmem [shape: f32[1,128], index: 6, kind: input, shape index: {}]   ;;  %s2016_s7 = inlined_call_operand.vmem [shape: bf16[128,128], index: 7, kind: input, shape index: {}]   ;;  %s2017_s8 = inlined_call_operand.vmem [shape: f32[1,128], index: 8, kind: input, shape index: {}]   ;;  %s2018_s9 = inlined_call_operand.vmem [shape: bf16[128,128], index: 9, kind: input, shape index: {}]   ;;  %s2019_s10 = inlined_call_operand.vmem [shape: f32[1,128], index: 10, kind: input, shape index: {}]   ;;  %s2020_s11 = inlined_call_operand.vmem [shape: bf16[128,128], index: 11, kind: input, shape index: {}]   ;;  %s2021_s12 = inlined_call_operand.vmem [shape: f32[1,128], index: 12, kind: input, shape index: {}]   ;;  %s2022_s13 = inlined_call_operand.vmem [shape: f32[2,1,64], index: 13, kind: output, shape index: {}]  }
   0x1 LB: > { %s1375_s26 = sadd.s32 4294967295, %s1670_s25   ;;  %p1379_p0 = scmp.ge.s32.totalorder %s1670_s25, 1  ;;  %s1670_s25 = sphi %s1744_s25, %s23_s25  }
   0x2   : > { %p415_p1 = scmp.lt.s32.totalorder %s1670_s25, 3 }
   0x4   : > { %p416_p2 = pnand %p1379_p0, %p415_p1 }
   0x5   : > { %p470_p3 = scmp.lt.s32.totalorder (!%p416_p2), %s1375_s26, 1 }
   0x6   : > { %419 = sbr.rel (%p416_p2) target bundleno = 904 (0x388), region = 72 }
   0xb   : > { %v1605_v0 = vld [vmem:[%s2014_s5 + $0x38] sm:$0xff]   ;;  %v1672_v1 = vmov 0.0   ;;  %v1606_v2 = vld [vmem:[%s2014_s5 + $0x30] sm:$0xff]   ;;  %vm1673_vm0 = vmmov 0   ;;  %v1607_v3 = vld [vmem:[%s2014_s5 + $0x28] sm:$0xff]   ;;  %s2024_s26 = smov (!%p470_p3, %s1375_s26), 1 }
   0xc   : > { %1501 = vmatprep.subr.bf16.mxu0 %v1672_v1  ;;  %1521 = vmatprep.subr.bf16.mxu1 %v1672_v1  ;;  %v1608_v4 = vld [vmem:[%s2014_s5 + $0x20] sm:$0xff]   ;;  %s1431_s18 = sshll.u32 %s2024_s26, 3  ;;  %v1609_v5 = vld [vmem:[%s2014_s5 + $0x18] sm:$0xff]   ;;  %v1610_v6 = vld [vmem:[%s2014_s5 + $0x10] sm:$0xff]   ;;  %s472_s15 = scalar_lea.vmem %s2009_s0, %s2024_s26  ;;  %vm887_vm1 = vcmask 130048   ;;  %vm1248_vm2 = vcmask 130112  }
   0xd   : > { %1502 = vmatpush3.bf16.msra.mxu0 %v1605_v0  ;;  %1517 = vmatprep.mubr.msk.bf16.mxu0 %vm1673_vm0, %v1672_v1  ;;  %s1785_s23 = scalar_lea.vmem %s2010_s1, %s1431_s18  ;;  %v1611_v7 = vld [vmem:[%s2014_s5 + $0x8] sm:$0xff]   ;;  %v1612_v8 = vld [vmem:[%s2014_s5] sm:$0xff]   ;;  %v1613_v10 = vld [vmem:[%s2018_s9 + $0x38] sm:$0xff]   ;;  %s1433_s28 = sshll.u32 %s2024_s26, 5  ;;  %vm1255_vm3 = vcmask 195712   ;;  %vm1262_vm4 = vcmask 261312  }
   0xe   : > { %1503 = vmatprep.subr.bf16.mxu0 %v1672_v1  ;;  %1537 = vmatprep.mubr.msk.bf16.mxu1 %vm1673_vm0, %v1672_v1  ;;  %v492_v9 = vld [vmem:[%s472_s15] sm:$0x1]  ;;  %v1614_v12 = vld [vmem:[%s2018_s9 + $0x30] sm:$0xff]   ;;  %v1615_v13 = vld [vmem:[%s2018_s9 + $0x28] sm:$0xff]   ;;  %vm1269_vm5 = vcmask 326912   ;;  %vm1276_vm6 = vcmask 392512   ;;  %s490_s20 = scalar_lea.vmem %s2022_s13, %s2024_s26 }
   0xf   : > { %v493_v11 = vpack.c.bf16 %v492_v9, %v492_v9  ;;  %v1616_v14 = vld [vmem:[%s2018_s9 + $0x20] sm:$0xff]   ;;  %v1617_v15 = vld [vmem:[%s2018_s9 + $0x18] sm:$0xff]   ;;  %v1618_v16 = vld [vmem:[%s2018_s9 + $0x10] sm:$0xff]   ;;  %vm1283_vm7 = vcmask 458112   ;;  %vm1290_vm8 = vcmask 523712   ;;  %vm1293_vm9 = vcmask 516096  }
  0x10   : > { %v1619_v17 = vld [vmem:[%s2018_s9 + $0x8] sm:$0xff]   ;;  %v1620_v18 = vld [vmem:[%s2018_s9] sm:$0xff]   ;;  %v1622_v20 = vld [vmem:[%s2016_s7 + $0x38] sm:$0xff]  }
  0x11   : > { %1504 = vmatpush3.bf16.msra.mxu0 %v1606_v2  ;;  %v1621_v19 = vld [vmem:[%s1785_s23] sm:$0xff]   ;;  %1522 = vmatpush3.bf16.msra.mxu1 %v1622_v20  ;;  %v1623_v21 = vld [vmem:[%s2016_s7 + $0x30] sm:$0xff]   ;;  %v1624_v22 = vld [vmem:[%s2016_s7 + $0x28] sm:$0xff]   ;;  %s482_s23 = scalar_lea.vmem %s2011_s2, %s1431_s18 }
  0x12   : > { %1505 = vmatprep.subr.bf16.mxu0 %v1672_v1  ;;  %1523 = vmatprep.subr.bf16.mxu1 %v1672_v1  ;;  %v1625_v23 = vld [vmem:[%s2016_s7 + $0x20] sm:$0xff]   ;;  %v1626_v24 = vld [vmem:[%s2016_s7 + $0x18] sm:$0xff]   ;;  %v1627_v25 = vld [vmem:[%s2016_s7 + $0x10] sm:$0xff]  }
  0x13   : > { %v1628_v26 = vld [vmem:[%s2016_s7 + $0x8] sm:$0xff]   ;;  %v1629_v27 = vld [vmem:[%s2016_s7] sm:$0xff]   ;;  %v1639_v20 = vld [vmem:[%s2020_s11 + $0x10] sm:$0xff]  }
  0x14   : > { %v510_v28 = vld [vmem:[%s2015_s6] sm:$0x1] }
  0x15   : > { %1506 = vmatpush3.bf16.msra.mxu0 %v1607_v3  ;;  %1524 = vmatpush3.bf16.msra.mxu1 %v1623_v21  ;;  %v1435_v41 = vld [vmem:[%s482_s23] sm:$0xff]   ;;  %v1640_v21 = vld [vmem:[%s2020_s11 + $0x8] sm:$0xff]   ;;  %s487_s23 = scalar_lea.vmem %s2012_s3, %s1433_s28 }
  0x16   : > { %1507 = vmatprep.subr.bf16.mxu0 %v1672_v1  ;;  %1525 = vmatprep.subr.bf16.mxu1 %v1672_v1  ;;  %v1402_v43 = vld [vmem:[%s2019_s10] ss:$0 sm:$0xff]  ;;  %v1436_v44 = vunpack.c.l.bf16 %v1435_v41  ;;  %v1437_v52 = vunpack.c.h.bf16 %v1435_v41 }
  0x17   : > { %v1630_v47 = vld [vmem:[%s2013_s4] sm:$0xff]  }
  0x18   : > { %v1439_v41 = vld [vmem:[%s487_s23] sm:$0xff]  }
  0x19   : > { %1508 = vmatpush3.bf16.msra.mxu0 %v1608_v4  ;;  %1526 = vmatpush3.bf16.msra.mxu1 %v1624_v22  ;;  %v1641_v22 = vld [vmem:[%s2020_s11] sm:$0xff]  }
  0x1a   : > { %1509 = vmatprep.subr.bf16.mxu0 %v1672_v1  ;;  %1527 = vmatprep.subr.bf16.mxu1 %v1672_v1 }
  0x1d   : > { %1510 = vmatpush3.bf16.msra.mxu0 %v1609_v5  ;;  %1528 = vmatpush3.bf16.msra.mxu1 %v1625_v23 }
  0x1e   : > { %1511 = vmatprep.subr.bf16.mxu0 %v1672_v1  ;;  %1529 = vmatprep.subr.bf16.mxu1 %v1672_v1 }
  0x21   : > { %1512 = vmatpush3.bf16.msra.mxu0 %v1610_v6  ;;  %1530 = vmatpush3.bf16.msra.mxu1 %v1626_v24 }
  0x22   : > { %1513 = vmatprep.subr.bf16.mxu0 %v1672_v1  ;;  %1531 = vmatprep.subr.bf16.mxu1 %v1672_v1 }
  0x25   : > { %1514 = vmatpush3.bf16.msra.mxu0 %v1611_v7  ;;  %1532 = vmatpush3.bf16.msra.mxu1 %v1627_v25 }
  0x26   : > { %1515 = vmatprep.subr.bf16.mxu0 %v1672_v1  ;;  %1533 = vmatprep.subr.bf16.mxu1 %v1672_v1 }
  0x29   : > { %1516 = vmatpush3.bf16.msra.mxu0 %v1612_v8  ;;  %1534 = vmatpush3.bf16.msra.mxu1 %v1628_v26 }
  0x2a   : > { %1541 = vmatprep.subr.bf16.mxu0 %v1672_v1  ;;  %1535 = vmatprep.subr.bf16.mxu1 %v1672_v1 }
  0x2c   : > { %1518 = vmatmul.mubr.bf16.vlgmr.msra.gmra.mxu0 %v493_v11 }
  0x2d   : > { %1542 = vmatpush3.bf16.msra.mxu0 %v1613_v10  ;;  %1557 = vmatprep.mubr.msk.bf16.mxu0 %vm1673_vm0, %v1672_v1 }
  0x2e   : > { %1543 = vmatprep.subr.bf16.mxu0 %v1672_v1  ;;  %1536 = vmatpush3.bf16.msra.mxu1 %v1629_v27 }
  0x31   : > { %1544 = vmatpush3.bf16.msra.mxu0 %v1614_v12  ;;  %v1631_v12 = vld [vmem:[%s2013_s4 + $0x8] sm:$0xff]  }
  0x32   : > { %1545 = vmatprep.subr.bf16.mxu0 %v1672_v1 }
  0x35   : > { %1546 = vmatpush3.bf16.msra.mxu0 %v1615_v13  ;;  %v1632_v13 = vld [vmem:[%s2013_s4 + $0x10] sm:$0xff]  }
  0x36   : > { %1547 = vmatprep.subr.bf16.mxu0 %v1672_v1 }
  0x39   : > { %1548 = vmatpush3.bf16.msra.mxu0 %v1616_v14  ;;  %v1633_v14 = vld [vmem:[%s2013_s4 + $0x18] sm:$0xff]  }
  0x3a   : > { %1549 = vmatprep.subr.bf16.mxu0 %v1672_v1 }
  0x3d   : > { %1550 = vmatpush3.bf16.msra.mxu0 %v1617_v15  ;;  %v1634_v15 = vld [vmem:[%s2020_s11 + $0x38] sm:$0xff]  }
  0x3e   : > { %1551 = vmatprep.subr.bf16.mxu0 %v1672_v1 }
  0x41   : > { %1552 = vmatpush3.bf16.msra.mxu0 %v1618_v16  ;;  %v1635_v16 = vld [vmem:[%s2020_s11 + $0x30] sm:$0xff]  }
  0x42   : > { %1553 = vmatprep.subr.bf16.mxu0 %v1672_v1 }
  0x45   : > { %1554 = vmatpush3.bf16.msra.mxu0 %v1619_v17  ;;  %v1636_v17 = vld [vmem:[%s2020_s11 + $0x28] sm:$0xff]  }
  0x46   : > { %1555 = vmatprep.subr.bf16.mxu0 %v1672_v1 }
  0x49   : > { %1556 = vmatpush3.bf16.msra.mxu0 %v1620_v18  ;;  %v1637_v18 = vld [vmem:[%s2020_s11 + $0x20] sm:$0xff]  }
  0x4c   : > { %1558 = vmatmul.mubr.bf16.vlgmr.msra.gmra.mxu0 %v1621_v19  ;;  %v1638_v19 = vld [vmem:[%s2020_s11 + $0x18] sm:$0xff]  }
  0xec   : > { %v593_v29 = vpop.f32.mrf.mxu0 }
  0xed   : > { %v594_v30 = vadd.f32 %v593_v29, %v510_v28 }
  0xee   : > { %v1519_v31 = vpop.f32.mrf.mxu0 }
  0xef   : > { %v599_v32 = vmul.f32 %v594_v30, %v594_v30 }
  0xf0   : > { %v596_v33 = vpop.f32.mrf.mxu0 }
  0xf1   : > { %v600_v34 = vmul.f32 %v599_v32, %v594_v30 }
  0xf2   : > { %v1520_v35 = vpop.f32.mrf.mxu0 }
  0xf3   : > { %v601_v36 = vmul.f32 0.044715, %v600_v34 }
  0xf5   : > { %v602_v37 = vadd.f32 %v601_v36, %v594_v30 }
  0xf7   : > { %v603_v38 = vmul.f32 0.7978846, %v602_v37 }
  0xf9   : > { %1642 = vtanh.f32 %v603_v38 }
 0x106   : > { %v1643_v39 = vpop.eup %1642 }
 0x107   : > { %v605_v40 = vadd.f32 1.0, %v1643_v39  ;;  %v1454_v39 = vld [vmem:[%s487_s23 + $0x8] sm:$0xff]  }
 0x109   : > { %v606_v42 = vmul.f32 0.5, %v605_v40  ;;  %v1420_v40 = vld [vmem:[%s2021_s12] ss:$0 sm:$0xff] }
 0x10b   : > { %v607_v45 = vmul.f32 %v606_v42, %v594_v30  ;;  %v1444_v42 = vunpack.c.l.bf16 %v1454_v39 }
 0x10c   : > { %v827_v46 = vpop.f32.mrf.mxu0 }
 0x10d   : > { %v828_v48 = vadd.f32 %v1402_v43, %v827_v46  ;;  %v608_v49 = vpack.c.bf16 %v607_v45, %v607_v45  ;;  %v1440_v45 = vunpack.c.l.bf16 %v1439_v41 }
 0x10e   : > { %v1559_v50 = vpop.f32.mrf.mxu0 }
 0x10f   : > { %v838_v51 = vadd.f32 %v1436_v44, %v828_v48  ;;  %1538 = vmatmul.mubr.bf16.vlgmr.msra.gmra.mxu1 %v608_v49  ;;  %v1445_v49 = vunpack.c.h.bf16 %v1454_v39  ;;  %v1456_v50 = vld [vmem:[%s487_s23 + $0x18] sm:$0xff]  }
 0x110   : > { %v830_v53 = vpop.f32.mrf.mxu0  ;;  %1563 = vmatprep.mubr.msk.bf16.mxu1 %vm887_vm1, %v1630_v47 }
 0x111   : > { %v840_v54 = vmul.f32 %v838_v51, %v838_v51  ;;  %v831_v55 = vadd.f32 %v1402_v43, %v830_v53 }
 0x112   : > { %v1560_v56 = vpop.f32.mrf.mxu0 }
 0x113   : > { %v842_v57 = vmul.f32 %v840_v54, %v838_v51  ;;  %v839_v58 = vadd.f32 %v1437_v52, %v831_v55  ;;  %v1441_v55 = vunpack.c.h.bf16 %v1439_v41  ;;  %v1455_v56 = vld [vmem:[%s487_s23 + $0x10] sm:$0xff]  }
 0x115   : > { %v844_v59 = vmul.f32 0.044715, %v842_v57  ;;  %v841_v60 = vmul.f32 %v839_v58, %v839_v58 }
 0x117   : > { %v846_v61 = vadd.f32 %v844_v59, %v838_v51  ;;  %v843_v62 = vmul.f32 %v841_v60, %v839_v58 }
 0x119   : > { %v848_v63 = vmul.f32 0.7978846, %v846_v61  ;;  %v845_v0 = vmul.f32 0.044715, %v843_v62 }
 0x11b   : > { %1644 = vtanh.f32 %v848_v63  ;;  %v847_v1 = vadd.f32 %v845_v0, %v839_v58  ;;  %v1448_v0 = vunpack.c.l.bf16 %v1455_v56 }
 0x11d   : > { %v849_v2 = vmul.f32 0.7978846, %v847_v1 }
 0x11f   : > { %1646 = vtanh.f32 %v849_v2 }
 0x128   : > { %v1645_v3 = vpop.eup %1644 }
 0x129   : > { %v852_v4 = vadd.f32 1.0, %v1645_v3 }
 0x12b   : > { %v854_v7 = vmul.f32 0.5, %v852_v4 }
 0x12c   : > { %v1647_v5 = vpop.eup %1646 }
 0x12d   : > { %v853_v6 = vadd.f32 1.0, %v1647_v5  ;;  %v856_v9 = vmul.f32 %v854_v7, %v838_v51 }
 0x12f   : > { %v855_v8 = vmul.f32 0.5, %v853_v6 }
 0x131   : > { %v857_v10 = vmul.f32 %v855_v8, %v839_v58  ;;  %v1452_v58 = vunpack.c.l.bf16 %v1456_v50 }
 0x133   : > { %v866_v11 = vpack.c.bf16 %v857_v10, %v856_v9 }
 0x135   : > { %1561 = vmatprep.subr.bf16.mxu1 %v866_v11 }
 0x136   : > { %1562 = vmatpush3.bf16.msra.mxu1 %v866_v11 }
 0x137   : > { %1571 = vmatprep.subr.bf16.mxu1 %v1634_v15 }
 0x139   : > { %1564 = vmatmul.mubr.msk.bf16.vlgmr.msra.gmra.mxu1 %vm887_vm1, %v1631_v12  ;;  %v1453_v12 = vunpack.c.h.bf16 %v1456_v50 }
 0x13a   : > { %1567 = vmatprep.mubr.msk.bf16.mxu1 %vm887_vm1, %v1632_v13  ;;  %1572 = vmatpush3.bf16.msra.mxu1 %v1634_v15  ;;  %v1449_v13 = vunpack.c.h.bf16 %v1455_v56  ;;  %v625_v56 = vld [vmem:[%s2017_s8] sm:$0x1] }
 0x13b   : > { %1573 = vmatprep.subr.bf16.mxu1 %v1635_v16 }
 0x13e   : > { %1574 = vmatpush3.bf16.msra.mxu1 %v1635_v16 }
 0x13f   : > { %1575 = vmatprep.subr.bf16.mxu1 %v1636_v17 }
 0x141   : > { %1568 = vmatmul.mubr.msk.bf16.gmra.mxu1 %vm887_vm1, %v1633_v14 }
 0x142   : > { %1576 = vmatpush3.bf16.msra.mxu1 %v1636_v17 }
 0x143   : > { %1577 = vmatprep.subr.bf16.mxu1 %v1637_v18 }
 0x146   : > { %1578 = vmatpush3.bf16.msra.mxu1 %v1637_v18 }
 0x147   : > { %1579 = vmatprep.subr.bf16.mxu1 %v1638_v19 }
 0x14a   : > { %1580 = vmatpush3.bf16.msra.mxu1 %v1638_v19 }
 0x14b   : > { %1581 = vmatprep.subr.bf16.mxu1 %v1639_v20 }
 0x14e   : > { %1582 = vmatpush3.bf16.msra.mxu1 %v1639_v20 }
 0x14f   : > { %1583 = vmatprep.subr.bf16.mxu1 %v1640_v21 }
 0x152   : > { %1584 = vmatpush3.bf16.msra.mxu1 %v1640_v21 }
 0x153   : > { %1585 = vmatprep.subr.bf16.mxu1 %v1641_v22 }
 0x156   : > { %1586 = vmatpush3.bf16.msra.mxu1 %v1641_v22 }
 0x1cf   : > { %v1920_v23 = vpop.f32.mrf.mxu1 }
 0x1d1   : > { %v1539_v24 = vpop.f32.mrf.mxu1 }
 0x1d3   : > { %v711_v25 = vpop.f32.mrf.mxu1 }
 0x1d5   : > { %v1540_v26 = vpop.f32.mrf.mxu1 }
 0x1f9   : > { %v1565_v27 = vpop.f32.mrf.mxu1 }
 0x1fb   : > { %v934_v28 = vpop.f32.mrf.mxu1 }
 0x1fd   : > { %v1566_v29 = vpop.f32.mrf.mxu1 }
 0x1fe   : > { %v966_v32 = vpack.c.bf16 %v1566_v29, %v1565_v27 }
 0x1ff   : > { %v937_v30 = vpop.f32.mrf.mxu1 }
 0x200   : > { %v965_v31 = vpack.c.bf16 %v937_v30, %v934_v28 }
 0x201   : > { %v1569_v33 = vpop.f32.mrf.mxu1 }
 0x202   : > { %1587 = vmatprep.mubr.bf16.mxu1 %v965_v31 }
 0x203   : > { %v950_v34 = vpop.f32.mrf.mxu1  ;;  %1588 = vmatmul.mubr.bf16.vlgmr.msra.gmra.mxu1 %v966_v32 }
 0x205   : > { %v1570_v35 = vpop.f32.mrf.mxu1 }
 0x206   : > { %v968_v38 = vpack.c.bf16 %v1570_v35, %v1569_v33 }
 0x207   : > { %v953_v36 = vpop.f32.mrf.mxu1 }
 0x208   : > { %v967_v37 = vpack.c.bf16 %v953_v36, %v950_v34 }
 0x20a   : > { %1591 = vmatprep.mubr.bf16.mxu1 %v967_v37 }
 0x20b   : > { %1592 = vmatmul.mubr.bf16.gmra.mxu1 %v968_v38 }
 0x2c3   : > { %v1589_v43 = vpop.f32.mrf.mxu1 }
 0x2c4   : > { %v1083_v44 = vadd.f32 %v1589_v43, %v1420_v40 }
 0x2c5   : > { %v1074_v46 = vpop.f32.mrf.mxu1 }
 0x2c6   : > { %v1929_v47 = vadd.f32 %v1444_v42, %v1083_v44  ;;  %v1075_v48 = vadd.f32 %v1420_v40, %v1074_v46  ;;  %v1201_v46 = vlaneseq }
 0x2c7   : > { %v1590_v51 = vpop.f32.mrf.mxu1 }
 0x2c8   : > { %v1131_v52 = vmul.f32 %v1929_v47, %v1929_v47  ;;  %v1933_v53 = vadd.f32 %v1440_v45, %v1075_v48  ;;  %v1086_v54 = vadd.f32 %v1590_v51, %v1420_v40 }
 0x2c9   : > { %v1077_v57 = vpop.f32.mrf.mxu1 }
 0x2ca   : > { %v1139_v59 = vmul.f32 %v1131_v52, %v1929_v47  ;;  %v1129_v60 = vmul.f32 %v1933_v53, %v1933_v53  ;;  %v1938_v61 = vadd.f32 %v1445_v49, %v1086_v54  ;;  %v1078_v62 = vadd.f32 %v1420_v40, %v1077_v57 }
 0x2cb   : > { %v1593_v63 = vpop.f32.mrf.mxu1  ;;  %v1978_v54 = vshrl.u32 %v1201_v46, 7 }
 0x2cc   : > { %v1137_v1 = vmul.f32 %v1129_v60, %v1933_v53  ;;  %v1132_v2 = vmul.f32 %v1938_v61, %v1938_v61  ;;  %v1943_v3 = vadd.f32 %v1441_v55, %v1078_v62  ;;  %v1099_v4 = vadd.f32 %v1593_v63, %v1420_v40 }
 0x2cd   : > { %v1090_v5 = vpop.f32.mrf.mxu1  ;;  %v1147_v6 = vmul.f32 0.044715, %v1139_v59  ;;  %v709_v59 = vadd.f32 %v1920_v23, %v625_v56  ;;  %v1203_v60 = vsub.s32 0, %v1978_v54 }
 0x2ce   : > { %v1140_v7 = vmul.f32 %v1132_v2, %v1938_v61  ;;  %v1130_v8 = vmul.f32 %v1943_v3, %v1943_v3  ;;  %v1948_v9 = vadd.f32 %v1452_v58, %v1099_v4  ;;  %v1091_v10 = vadd.f32 %v1420_v40, %v1090_v5 }
 0x2cf   : > { %v1594_v11 = vpop.f32.mrf.mxu1  ;;  %v1155_v14 = vadd.f32 %v1147_v6, %v1929_v47  ;;  %v1145_v15 = vmul.f32 0.044715, %v1137_v1  ;;  %v1204_v5 = vrot.slane %v709_v59, %v1203_v60 }
 0x2d0   : > { %v1148_v16 = vmul.f32 0.044715, %v1140_v7  ;;  %v1138_v17 = vmul.f32 %v1130_v8, %v1943_v3  ;;  %v1135_v18 = vmul.f32 %v1948_v9, %v1948_v9  ;;  %v1954_v19 = vadd.f32 %v1448_v0, %v1091_v10 }
 0x2d1   : > { %v1102_v20 = vadd.f32 %v1594_v11, %v1420_v40  ;;  %v1093_v21 = vpop.f32.mrf.mxu1  ;;  %v1163_v22 = vmul.f32 0.7978846, %v1155_v14  ;;  %v1153_v24 = vadd.f32 %v1145_v15, %v1933_v53 }
 0x2d2   : > { %v1146_v25 = vmul.f32 0.044715, %v1138_v17  ;;  %v1143_v26 = vmul.f32 %v1135_v18, %v1948_v9  ;;  %v1133_v27 = vmul.f32 %v1954_v19, %v1954_v19  ;;  %v1094_v28 = vadd.f32 %v1420_v40, %v1093_v21 }
 0x2d3   : > { %v1960_v29 = vadd.f32 %v1453_v12, %v1102_v20  ;;  %1648 = vtanh.f32 %v1163_v22  ;;  %v1161_v30 = vmul.f32 0.7978846, %v1153_v24  ;;  %v1156_v31 = vadd.f32 %v1148_v16, %v1938_v61 }
 0x2d4   : > { %v1151_v32 = vmul.f32 0.044715, %v1143_v26  ;;  %v1141_v33 = vmul.f32 %v1133_v27, %v1954_v19  ;;  %v1964_v34 = vadd.f32 %v1449_v13, %v1094_v28  ;;  %v1154_v35 = vadd.f32 %v1146_v25, %v1943_v3 }
 0x2d5   : > { %v1136_v36 = vmul.f32 %v1960_v29, %v1960_v29  ;;  %1650 = vtanh.f32 %v1161_v30  ;;  %v1164_v37 = vmul.f32 0.7978846, %v1156_v31 }
 0x2d6   : > { %v1149_v38 = vmul.f32 0.044715, %v1141_v33  ;;  %v1134_v39 = vmul.f32 %v1964_v34, %v1964_v34  ;;  %v1162_v40 = vmul.f32 0.7978846, %v1154_v35  ;;  %v1159_v41 = vadd.f32 %v1151_v32, %v1948_v9 }
 0x2d7   : > { %v1144_v42 = vmul.f32 %v1136_v36, %v1960_v29  ;;  %1652 = vtanh.f32 %v1164_v37 }
 0x2d8   : > { %v1142_v43 = vmul.f32 %v1134_v39, %v1964_v34  ;;  %1654 = vtanh.f32 %v1162_v40  ;;  %v1157_v44 = vadd.f32 %v1149_v38, %v1954_v19  ;;  %v1167_v45 = vmul.f32 0.7978846, %v1159_v41 }
 0x2d9   : > { %v1152_v48 = vmul.f32 0.044715, %v1144_v42 }
 0x2da   : > { %v1150_v49 = vmul.f32 0.044715, %v1142_v43  ;;  %v1165_v50 = vmul.f32 0.7978846, %v1157_v44  ;;  %1656 = vtanh.f32 %v1167_v45 }
 0x2db   : > { %v1160_v51 = vadd.f32 %v1152_v48, %v1960_v29 }
 0x2dc   : > { %1658 = vtanh.f32 %v1165_v50  ;;  %v1158_v52 = vadd.f32 %v1150_v49, %v1964_v34 }
 0x2dd   : > { %v1168_v55 = vmul.f32 0.7978846, %v1160_v51 }
 0x2de   : > { %v1166_v57 = vmul.f32 0.7978846, %v1158_v52 }
 0x2df   : > { %1660 = vtanh.f32 %v1168_v55 }
 0x2e0   : > { %v1649_v58 = vpop.eup %1648  ;;  %1662 = vtanh.f32 %v1166_v57 }
 0x2e1   : > { %v1179_v62 = vadd.f32 1.0, %v1649_v58 }
 0x2e2   : > { %v1651_v63 = vpop.eup %1650 }
 0x2e3   : > { %v1187_v0 = vmul.f32 0.5, %v1179_v62  ;;  %v1177_v1 = vadd.f32 1.0, %v1651_v63 }
 0x2e4   : > { %v1653_v2 = vpop.eup %1652 }
 0x2e5   : > { %v1655_v4 = vpop.eup %1654  ;;  %v1195_v6 = vmul.f32 %v1187_v0, %v1929_v47  ;;  %v1185_v7 = vmul.f32 0.5, %v1177_v1  ;;  %v1180_v8 = vadd.f32 1.0, %v1653_v2 }
 0x2e6   : > { %v1178_v10 = vadd.f32 1.0, %v1655_v4 }
 0x2e7   : > { %v1657_v11 = vpop.eup %1656  ;;  %v1207_v12 = vmul.f32 %v1204_v5, %v1195_v6  ;;  %v1193_v13 = vmul.f32 %v1185_v7, %v1933_v53  ;;  %v1188_v14 = vmul.f32 0.5, %v1180_v8 }
 0x2e8   : > { %v1186_v23 = vmul.f32 0.5, %v1178_v10  ;;  %v1183_v18 = vadd.f32 1.0, %v1657_v11 }
 0x2e9   : > { %v1659_v15 = vpop.eup %1658  ;;  %1217 = vadd.xlane.f32.xlu1 %v1207_v12  ;;  %v1205_v16 = vmul.f32 %v1204_v5, %v1193_v13  ;;  %v1196_v17 = vmul.f32 %v1188_v14, %v1938_v61 }
 0x2ea   : > { %v1194_v20 = vmul.f32 %v1186_v23, %v1943_v3  ;;  %v1181_v21 = vadd.f32 1.0, %v1659_v15  ;;  %v1191_v27 = vmul.f32 0.5, %v1183_v18 }
 0x2eb   : > { %1213 = vadd.xlane.f32.xlu0 %v1205_v16  ;;  %v1208_v47 = vmul.f32 %v1204_v5, %v1196_v17 }
 0x2ec   : > { %v1661_v22 = vpop.eup %1660  ;;  %v1206_v24 = vmul.f32 %v1204_v5, %v1194_v20  ;;  %v1189_v25 = vmul.f32 0.5, %v1181_v21  ;;  %v1199_v33 = vmul.f32 %v1191_v27, %v1948_v9 }
 0x2ed   : > { %v1663_v26 = vpop.eup %1662  ;;  %1219 = vadd.xlane.f32.xlu1 %v1208_v47  ;;  %v1184_v53 = vadd.f32 1.0, %v1661_v22 }
 0x2ee   : > { %v1197_v28 = vmul.f32 %v1189_v25, %v1954_v19  ;;  %v1182_v30 = vadd.f32 1.0, %v1663_v26  ;;  %v1211_v37 = vmul.f32 %v1204_v5, %v1199_v33  ;;  %v1238_v19 = vand.u32 127, %v1201_v46 }
 0x2ef   : > { %1215 = vadd.xlane.f32.xlu0 %v1206_v24  ;;  %v1192_v61 = vmul.f32 0.5, %v1184_v53 }
 0x2f0   : > { %v1209_v31 = vmul.f32 %v1204_v5, %v1197_v28  ;;  %v1190_v32 = vmul.f32 0.5, %v1182_v30  ;;  %v1243_v39 = vadd.s32 4294967288, %v1238_v19  ;;  %v1250_v40 = vadd.s32 4294967280, %v1238_v19 }
 0x2f1   : > { %v1200_v36 = vmul.f32 %v1192_v61, %v1960_v29  ;;  %v1257_v43 = vadd.s32 4294967272, %v1238_v19  ;;  %v1241_v9 = vsub.s32 %v1238_v19, %v1978_v54  ;;  %v1264_v44 = vadd.s32 4294967264, %v1238_v19 }
 0x2f2   : > { %v1198_v3 = vmul.f32 %v1190_v32, %v1964_v34  ;;  %v1246_v34 = vsub.s32 %v1243_v39, %v1978_v54  ;;  %v1253_v45 = vsub.s32 %v1250_v40, %v1978_v54  ;;  %v1271_v49 = vadd.s32 4294967256, %v1238_v19 }
 0x2f3   : > { %1221 = vadd.xlane.f32.xlu0 %v1209_v31  ;;  %v1212_v38 = vmul.f32 %v1204_v5, %v1200_v36  ;;  %v1260_v29 = vsub.s32 %v1257_v43, %v1978_v54  ;;  %v1267_v52 = vsub.s32 %v1264_v44, %v1978_v54  ;;  %v1278_v55 = vadd.s32 4294967248, %v1238_v19 }
 0x2f4   : > { %v1210_v35 = vmul.f32 %v1204_v5, %v1198_v3  ;;  %v1274_v62 = vsub.s32 %v1271_v49, %v1978_v54  ;;  %v1285_v63 = vadd.s32 4294967240, %v1238_v19 }
 0x2f5   : > { %v1281_v1 = vsub.s32 %v1278_v55, %v1978_v54 }
 0x2f6   : > { %1223 = vadd.xlane.f32.xlu1 %v1210_v35  ;;  %v1288_v7 = vsub.s32 %v1285_v63, %v1978_v54 }
 0x2f7   : > { %1225 = vadd.xlane.f32.xlu0 %v1211_v37 }
 0x2fa   : > { %1227 = vadd.xlane.f32.xlu1 %v1212_v38 }
 0x372   : > { %v1218_v41 = vpop.xlane.xlu1 %1217 }
 0x373   : > { %v1254_v56 = vrot.slane %v1218_v41, %v1253_v45 }
 0x374   : > { %v1214_v42 = vpop.xlane.xlu0 %1213 }
 0x375   : > { %v1242_v50 = vrot.slane %v1214_v42, %v1241_v9 }
 0x376   : > { %v1220_v46 = vpop.xlane.xlu1 %1219 }
 0x377   : > { %v1261_v58 = vrot.slane %v1220_v46, %v1260_v29 }
 0x378   : > { %v1216_v48 = vpop.xlane.xlu0 %1215 }
 0x379   : > { %v1247_v51 = vrot.slane %v1216_v48, %v1246_v34 }
 0x37b   : > { %v1249_v57 = vsel %vm1248_vm2, %v1247_v51, %v1242_v50 }
 0x37c   : > { %v1256_v59 = vsel %vm1255_vm3, %v1254_v56, %v1249_v57  ;;  %v1222_v60 = vpop.xlane.xlu0 %1221 }
 0x37d   : > { %v1268_v0 = vrot.slane %v1222_v60, %v1267_v52  ;;  %v1263_v2 = vsel %vm1262_vm4, %v1261_v58, %v1256_v59 }
 0x37f   : > { %v1224_v4 = vpop.xlane.xlu1 %1223  ;;  %v1270_v8 = vsel %vm1269_vm5, %v1268_v0, %v1263_v2 }
 0x380   : > { %v1275_v5 = vrot.slane %v1224_v4, %v1274_v62  ;;  %v1226_v6 = vpop.xlane.xlu0 %1225 }
 0x381   : > { %v1282_v10 = vrot.slane %v1226_v6, %v1281_v1 }
 0x382   : > { %v1277_v11 = vsel %vm1276_vm6, %v1275_v5, %v1270_v8 }
 0x383   : > { %v1228_v12 = vpop.xlane.xlu1 %1227  ;;  %v1284_v14 = vsel %vm1283_vm7, %v1282_v10, %v1277_v11 }
 0x384   : > { %v1289_v13 = vrot.slane %v1228_v12, %v1288_v7 }
 0x386   : > { %v1291_v23 = vsel %vm1290_vm8, %v1289_v13, %v1284_v14 }
 0x387   : > { %1294 = vst.msk [vmem:[%s490_s20] sm:$0x1] %vm1293_vm9, %v1291_v23 }
 0x388 PF: > { %s23_s25 = sadd.s32 1, %s1670_s25  }
 0x389   : > { %p20_p4 = scmp.ge.s32.totalorder %s23_s25, 4  }
 0x38b   :  { %22 = sbr.rel (!%p20_p4) target bundleno = 1 (0x1), region = 111 }

</bundles_post_ra>
